<compile_context>
chip_gen: v6e
topology: v6e:2x2x1
jax: 0.10.0
libtpu: 0.0.40
codegen_flags: <defaults>
</compile_context>

<pallas_src>
import functools

import jax
import jax.numpy as jnp
from jax.experimental import pallas as pl
from jax.experimental.pallas import tpu as pltpu


def _round_up(x, m):
    return ((x + m - 1) // m) * m


def _batch_block(b, max_block=8):
    # biggest batch block <= max_block that divides B (B is small in the demo)
    return max_block if b % max_block == 0 else b


# ----------------------------------------------------------------------------
# Kernel 1 (fused): per-batch-block vision L2-norm + map_vision_to_v
#                   + pairwise map_two_v_to_edge
#   vision_feat (Bb, DV, NF) -> vnorm (Bb, DV, NF), feat (Bb, NF, dim_v),
#                               edge_flat (Bb, NF, NF*dim_edge)
# ----------------------------------------------------------------------------
def vision_graph_kernel(v_ref, wv_ref, we0_ref, we1_ref,
                        vnorm_ref, feat_ref, edge_ref):
    v = v_ref[...]                                               # (Bb, DV, NF) f32
    norm = jnp.sqrt(jnp.sum(v * v, axis=1, keepdims=True))       # ||.||_2 over dim_vision
    vn = v / (norm + 1e-12)
    vnorm_ref[...] = vn                                          # emit normalized vision

    bb, dv, nf = v.shape
    dim_v = wv_ref.shape[1]
    de = we0_ref.shape[1]

    # map_vision_to_v: one big (Bb*NF, DV) @ (DV, dim_v) GEMM, bf16 MXU operands.
    rows = jnp.transpose(vn, (0, 2, 1)).astype(jnp.bfloat16).reshape(bb * nf, dv)
    feat2 = jnp.dot(rows, wv_ref[...],
                    preferred_element_type=jnp.float32)          # (Bb*NF, dim_v) f32
    feat_ref[...] = feat2.reshape(bb, nf, dim_v)

    # map_two_v_to_edge split into the two weight halves (no pairwise concat GEMM).
    fb = feat2.astype(jnp.bfloat16)
    a = jnp.dot(fb, we0_ref[...],
                preferred_element_type=jnp.float32).reshape(bb, nf, de)   # feat_j half
    c = jnp.dot(fb, we1_ref[...],
                preferred_element_type=jnp.float32).reshape(bb, nf, de)   # feat_i half

    # edge[b, i, j*E:(j+1)*E] = c[b, i] + a[b, j]   -> lane-dense (NF*E) rows.
    edge_ref[...] = jnp.concatenate([c + a[:, j:j + 1, :] for j in range(nf)],
                                    axis=-1)                     # (Bb, NF, NF*E)


def vision_graph(vision_feat, w_map_v, w_map_edge):
    B, DV, NF = vision_feat.shape
    dim_v = w_map_v.shape[0]
    E = w_map_edge.shape[0]
    Bb = _batch_block(B)

    # host-side: pre-transpose weights once and cast MXU operands to bf16.
    wv_t = jnp.asarray(w_map_v.T, jnp.bfloat16)                  # (DV, dim_v)
    we0_t = jnp.asarray(w_map_edge[:, :dim_v].T, jnp.bfloat16)   # acts on feat[b, j]
    we1_t = jnp.asarray(w_map_edge[:, dim_v:].T, jnp.bfloat16)   # acts on feat[b, i]

    vnorm, feat, edge_flat = pl.pallas_call(
        vision_graph_kernel,
        out_shape=(jax.ShapeDtypeStruct((B, DV, NF), jnp.float32),
                   jax.ShapeDtypeStruct((B, NF, dim_v), jnp.float32),
                   jax.ShapeDtypeStruct((B, NF, NF * E), jnp.float32)),
        grid=(B // Bb,),
        in_specs=[pl.BlockSpec((Bb, DV, NF), lambda b: (b, 0, 0)),
                  pl.BlockSpec((DV, dim_v), lambda b: (0, 0)),
                  pl.BlockSpec((dim_v, E), lambda b: (0, 0)),
                  pl.BlockSpec((dim_v, E), lambda b: (0, 0))],
        out_specs=(pl.BlockSpec((Bb, DV, NF), lambda b: (b, 0, 0)),
                   pl.BlockSpec((Bb, NF, dim_v), lambda b: (b, 0, 0)),
                   pl.BlockSpec((Bb, NF, NF * E), lambda b: (b, 0, 0))),
        compiler_params=pltpu.CompilerParams(
            dimension_semantics=("parallel",),
            vmem_limit_bytes=64 * 1024 * 1024),
    )(vision_feat, wv_t, we0_t, we1_t)

    feat_edge = edge_flat.reshape(B, NF, NF, E)   # free row-major split outside kernel
    return vnorm, feat, feat_edge


# ----------------------------------------------------------------------------
# Kernel 2: POEM_LMH classification head (batch-gridded, weights VMEM-resident)
#   semantic attention -> Classifier_lmh (lin11/lin12 + Fusion + BN eval)
#   -> base log-softmax -> LMH bias branch -> predicted logits + entropy
# ----------------------------------------------------------------------------
def head_kernel(qh_ref, mem_ref, csem_ref, bias_ref,
                wsem_ref, bsem_ref,
                w11a_ref, w11b_ref, b11_ref,
                w12_ref, b12_ref,
                bng_ref, bnb_ref, bnm_ref, bnv_ref,
                wbase_ref, bbase_ref,
                wblin_ref, bblin_ref, smooth_ref,
                pred_ref, ent_ref, *, num_classes):
    qh = qh_ref[...]                     # (Bb, H)
    mem = mem_ref[...]                   # (Bb, G*DV)
    csem = csem_ref[...]                 # (Bb, T, H)
    bias_in = bias_ref[...]              # (Bb, Cp)  (padded classes are zero)
    qh_b = qh.astype(jnp.bfloat16)

    # semantic attention: softmax(Linear(H -> T)(questions_hidden))
    sem_logit = jnp.dot(qh_b, wsem_ref[...],
                        preferred_element_type=jnp.float32) + bsem_ref[...]     # (Bb, T)
    sem_logit = sem_logit - jnp.max(sem_logit, axis=-1, keepdims=True)
    sem_e = jnp.exp(sem_logit)
    sem_att = sem_e * pl.reciprocal(jnp.sum(sem_e, axis=-1, keepdims=True),
                                    approx=True)                                # (Bb, T)

    # bmm(sem_att (B,1,T), cache_semantic (B,T,H)) -> (B, H)
    csem_att = jnp.sum(sem_att[:, :, None] * csem, axis=1)                      # (Bb, H)

    # Classifier_lmh: concat(mem, csem_att) handled as split weight halves.
    x1 = (jnp.dot(mem.astype(jnp.bfloat16), w11a_ref[...],
                  preferred_element_type=jnp.float32)
          + jnp.dot(csem_att.astype(jnp.bfloat16), w11b_ref[...],
                    preferred_element_type=jnp.float32)
          + b11_ref[...])                                                       # (Bb, F)
    x2 = jnp.dot(qh_b, w12_ref[...],
                 preferred_element_type=jnp.float32) + b12_ref[...]             # (Bb, F)
    # Fusion: -(x - y)^2 + relu(x + y)
    fused = -(x1 - x2) ** 2 + jnp.maximum(x1 + x2, 0.0)
    # BatchNorm1d, eval mode
    cls_feat = (fused - bnm_ref[...]) * jax.lax.rsqrt(bnv_ref[...] + 1e-5) \
               * bng_ref[...] + bnb_ref[...]                                    # (Bb, F)
    cf_b = cls_feat.astype(jnp.bfloat16)

    # base_logits = log(softmax(base_classifier(cls_feat)) + 1e-16)
    z = jnp.dot(cf_b, wbase_ref[...],
                preferred_element_type=jnp.float32) + bbase_ref[...]            # (Bb, Cp)
    bb, cp = z.shape
    col = jax.lax.broadcasted_iota(jnp.int32, (bb, cp), 1)
    valid = col < num_classes                                                    # mask padded classes

    z = jnp.where(valid, z, -1e30)
    z = z - jnp.max(z, axis=-1, keepdims=True)
    ez = jnp.exp(z)
    sm = ez * pl.reciprocal(jnp.sum(ez, axis=-1, keepdims=True), approx=True)
    base_logits = jnp.log(sm + 1e-16)

    # LMH bias branch
    bias_factor = jnp.dot(cf_b, wblin_ref[...],
                          preferred_element_type=jnp.float32) + bblin_ref[...]  # (Bb, 1)
    bias_factor = jnp.logaddexp(0.0, bias_factor)                               # softplus
    soften = 1.0 / (1.0 + jnp.exp(-smooth_ref[...]))                            # sigmoid, (1,1)
    bias_logits = bias_factor * jnp.log(bias_in + soften + 1e-16)               # (Bb, Cp)
    bias_logits = jnp.where(valid, bias_logits, -1e30)

    # predicted_logits = softmax(base_logits + bias_logits)
    p = jnp.where(valid, base_logits + bias_logits, -1e30)
    p = p - jnp.max(p, axis=-1, keepdims=True)
    ep = jnp.exp(p)
    pred_ref[...] = ep * pl.reciprocal(jnp.sum(ep, axis=-1, keepdims=True),
                                       approx=True)

    # entropy of softmax(bias_logits), padded classes contribute exactly zero
    q = bias_logits - jnp.max(bias_logits, axis=-1, keepdims=True)
    eq = jnp.exp(q)
    bsm = eq * pl.reciprocal(jnp.sum(eq, axis=-1, keepdims=True), approx=True)
    ent_ref[...] = -jnp.sum(jnp.where(valid, bsm * jnp.log(bsm + 1e-16), 0.0),
                            axis=-1, keepdims=True)


def head(params, questions_hidden, mem, cache_semantic, bias):
    B, H = questions_hidden.shape
    GDV = mem.shape[1]
    T = cache_semantic.shape[1]
    F = params["w11"].shape[0]
    C = params["w_base"].shape[0]
    Cp = _round_up(C, 128)              # lane-dense class dim; sliced off below
    Bb = _batch_block(B)
    bf = jnp.bfloat16

    # host-side: pre-transposed bf16 weight operands, zero-padded class dim.
    wsem_t = jnp.asarray(params["w_sem"].T, bf)                  # (H, T)
    w11a_t = jnp.asarray(params["w11"][:, :GDV].T, bf)           # (GDV, F) acts on mem
    w11b_t = jnp.asarray(params["w11"][:, GDV:].T, bf)           # (H, F)   acts on attended semantic
    w12_t = jnp.asarray(params["w12"].T, bf)                     # (H, F)
    wbase_t = jnp.pad(jnp.asarray(params["w_base"].T, bf), ((0, 0), (0, Cp - C)))
    bbase_p = jnp.pad(params["b_base"], ((0, 0), (0, Cp - C)))
    wblin_t = jnp.asarray(params["w_blin"].T, bf)                # (F, 1)
    bias_p = jnp.pad(bias, ((0, 0), (0, Cp - C)))

    kernel = functools.partial(head_kernel, num_classes=C)
    # TODO(synk): for very large num_classes / in_features the class and
    # contraction dims should get their own grid axes (VMEM tiling, esp. v7x).
    pred_p, ent = pl.pallas_call(
        kernel,
        out_shape=(jax.ShapeDtypeStruct((B, Cp), jnp.float32),
                   jax.ShapeDtypeStruct((B, 1), jnp.float32)),
        grid=(B // Bb,),
        in_specs=[pl.BlockSpec((Bb, H), lambda b: (b, 0)),
                  pl.BlockSpec((Bb, GDV), lambda b: (b, 0)),
                  pl.BlockSpec((Bb, T, H), lambda b: (b, 0, 0)),
                  pl.BlockSpec((Bb, Cp), lambda b: (b, 0)),
                  pl.BlockSpec((H, T), lambda b: (0, 0)),
                  pl.BlockSpec((1, T), lambda b: (0, 0)),
                  pl.BlockSpec((GDV, F), lambda b: (0, 0)),
                  pl.BlockSpec((H, F), lambda b: (0, 0)),
                  pl.BlockSpec((1, F), lambda b: (0, 0)),
                  pl.BlockSpec((H, F), lambda b: (0, 0)),
                  pl.BlockSpec((1, F), lambda b: (0, 0)),
                  pl.BlockSpec((1, F), lambda b: (0, 0)),
                  pl.BlockSpec((1, F), lambda b: (0, 0)),
                  pl.BlockSpec((1, F), lambda b: (0, 0)),
                  pl.BlockSpec((1, F), lambda b: (0, 0)),
                  pl.BlockSpec((F, Cp), lambda b: (0, 0)),
                  pl.BlockSpec((1, Cp), lambda b: (0, 0)),
                  pl.BlockSpec((F, 1), lambda b: (0, 0)),
                  pl.BlockSpec((1, 1), lambda b: (0, 0)),
                  pl.BlockSpec((1, 1), lambda b: (0, 0))],
        out_specs=(pl.BlockSpec((Bb, Cp), lambda b: (b, 0)),
                   pl.BlockSpec((Bb, 1), lambda b: (b, 0))),
        compiler_params=pltpu.CompilerParams(
            dimension_semantics=("parallel",),
            vmem_limit_bytes=64 * 1024 * 1024),
    )(questions_hidden, mem, cache_semantic, bias_p,
      wsem_t, params["b_sem"],
      w11a_t, w11b_t, params["b11"],
      w12_t, params["b12"],
      params["bn_gamma"], params["bn_beta"], params["bn_mean"], params["bn_var"],
      wbase_t, bbase_p,
      wblin_t, params["b_blin"], params["smooth"])
    return pred_p[:, :C], ent[:, 0]


def poem_lmh_forward(params, questions_hidden, mem, cache_semantic,
                     vision_feat, relation_mask, bias):
    # relation_mask is only consumed by the external NMN modules (not available).
    vnorm, feat_inputs, feat_edge = vision_graph(
        vision_feat, params["w_map_v"], params["w_map_edge"])
    predicted_logits, entropy = head(params, questions_hidden, mem,
                                     cache_semantic, bias)
    others = {"feat_inputs": feat_inputs, "feat_edge": feat_edge,
              "vision_feat_norm": vnorm}
    return predicted_logits, entropy, others


# ----------------------------------------------------------------------------
# Deterministic parameter construction (xavier_uniform weights, zero biases)
# ----------------------------------------------------------------------------
def xavier(key, out_f, in_f):
    bound = (6.0 / (in_f + out_f)) ** 0.5
    return jax.random.uniform(key, (out_f, in_f), jnp.float32, -bound, bound)


def make_params(key, *, dim_vision, dim_v, dim_edge, dim_hidden,
                glimpses, T_ctrl, cls_fc_dim, num_classes):
    ks = jax.random.split(key, 8)
    in0 = glimpses * dim_vision + dim_hidden
    return {
        "w_map_v":    xavier(ks[0], dim_v, dim_vision),
        "w_map_edge": xavier(ks[1], dim_edge, 2 * dim_v),
        "w_sem":      xavier(ks[2], T_ctrl, dim_hidden),
        "b_sem":      jnp.zeros((1, T_ctrl), jnp.float32),
        "w11":        xavier(ks[3], cls_fc_dim, in0),
        "b11":        jnp.zeros((1, cls_fc_dim), jnp.float32),
        "w12":        xavier(ks[4], cls_fc_dim, dim_hidden),
        "b12":        jnp.zeros((1, cls_fc_dim), jnp.float32),
        "bn_gamma":   jnp.ones((1, cls_fc_dim), jnp.float32),
        "bn_beta":    jnp.zeros((1, cls_fc_dim), jnp.float32),
        "bn_mean":    jnp.zeros((1, cls_fc_dim), jnp.float32),
        "bn_var":     jnp.ones((1, cls_fc_dim), jnp.float32),
        "w_base":     xavier(ks[5], num_classes, cls_fc_dim),
        "b_base":     jnp.zeros((1, num_classes), jnp.float32),
        "w_blin":     xavier(ks[6], 1, cls_fc_dim),
        "b_blin":     jnp.zeros((1, 1), jnp.float32),
        "smooth":     jnp.full((1, 1), -1.0, jnp.float32),
    }


if __name__ == "__main__":
    B, dim_vision, num_feat = 2, 16, 8
    dim_v, dim_edge = 8, 16
    dim_hidden, glimpses, T_ctrl = 32, 2, 4
    cls_fc_dim, num_classes = 32, 10

    key = jax.random.PRNGKey(0)
    kp, k1, k2, k3, k4, k5 = jax.random.split(key, 6)

    params = make_params(kp, dim_vision=dim_vision, dim_v=dim_v,
                         dim_edge=dim_edge, dim_hidden=dim_hidden,
                         glimpses=glimpses, T_ctrl=T_ctrl,
                         cls_fc_dim=cls_fc_dim, num_classes=num_classes)

    # synthetic stand-ins for the outputs of the (external) encoder/controller/NMN loop
    questions_hidden = jax.random.normal(k1, (B, dim_hidden), jnp.float32)
    mem = jax.random.normal(k2, (B, glimpses * dim_vision), jnp.float32)
    cache_semantic = jax.random.normal(k3, (B, T_ctrl, dim_hidden), jnp.float32)
    vision_feat = jax.random.normal(k4, (B, dim_vision, num_feat), jnp.float32)
    relation_mask = jnp.zeros((B, num_feat, num_feat), jnp.float32)  # used only by NMN modules
    bias = jax.nn.softmax(jax.random.normal(k5, (B, num_classes), jnp.float32), axis=-1)

    forward = jax.jit(poem_lmh_forward)
    predicted_logits, entropy, others = forward(
        params, questions_hidden, mem, cache_semantic,
        vision_feat, relation_mask, bias)

    jax.block_until_ready((predicted_logits, entropy,
                           others["feat_inputs"], others["feat_edge"],
                           others["vision_feat_norm"]))

    assert predicted_logits.shape == (B, num_classes)
    assert entropy.shape == (B,)
    assert others["feat_inputs"].shape == (B, num_feat, dim_v)
    assert others["feat_edge"].shape == (B, num_feat, num_feat, dim_edge)
    assert others["vision_feat_norm"].shape == (B, dim_vision, num_feat)
    print("KERNEL_OK")
</pallas_src>

<mosaic_0001>
module attributes {stable_mosaic.version = 11 : i64} {
  func.func @head_kernel(%arg0: i32, %arg1: memref<2x32xf32, #tpu.memory_space<vmem>>, %arg2: memref<2x32xf32, #tpu.memory_space<vmem>>, %arg3: memref<2x4x32xf32, #tpu.memory_space<vmem>>, %arg4: memref<2x128xf32, #tpu.memory_space<vmem>>, %arg5: memref<32x4xbf16, #tpu.memory_space<vmem>>, %arg6: memref<1x4xf32, #tpu.memory_space<vmem>>, %arg7: memref<32x32xbf16, #tpu.memory_space<vmem>>, %arg8: memref<32x32xbf16, #tpu.memory_space<vmem>>, %arg9: memref<1x32xf32, #tpu.memory_space<vmem>>, %arg10: memref<32x32xbf16, #tpu.memory_space<vmem>>, %arg11: memref<1x32xf32, #tpu.memory_space<vmem>>, %arg12: memref<1x32xf32, #tpu.memory_space<vmem>>, %arg13: memref<1x32xf32, #tpu.memory_space<vmem>>, %arg14: memref<1x32xf32, #tpu.memory_space<vmem>>, %arg15: memref<1x32xf32, #tpu.memory_space<vmem>>, %arg16: memref<32x128xbf16, #tpu.memory_space<vmem>>, %arg17: memref<1x128xf32, #tpu.memory_space<vmem>>, %arg18: memref<32x1xbf16, #tpu.memory_space<vmem>>, %arg19: memref<1x1xf32, #tpu.memory_space<vmem>>, %arg20: memref<1x1xf32, #tpu.memory_space<vmem>>, %arg21: memref<2x128xf32, #tpu.memory_space<vmem>>, %arg22: memref<2x1xf32, #tpu.memory_space<vmem>>) attributes {dimension_semantics = [#tpu.dimension_semantics<parallel>], iteration_bounds = array<i64: 1>, scalar_prefetch = 0 : i64, scratch_operands = 0 : i64, tpu.core_type = #tpu.core_type<tc>, window_params = [{transform_indices = @transform_0, window_bounds = array<i64: 2, 32>}, {transform_indices = @transform_1, window_bounds = array<i64: 2, 32>}, {transform_indices = @transform_2, window_bounds = array<i64: 2, 4, 32>}, {transform_indices = @transform_3, window_bounds = array<i64: 2, 128>}, {pipeline_mode = #tpu.pipeline_mode<synchronous>, transform_indices = @transform_4, window_bounds = array<i64: 32, 4>}, {pipeline_mode = #tpu.pipeline_mode<synchronous>, transform_indices = @transform_5, window_bounds = array<i64: 1, 4>}, {pipeline_mode = #tpu.pipeline_mode<synchronous>, transform_indices = @transform_6, window_bounds = array<i64: 32, 32>}, {pipeline_mode = #tpu.pipeline_mode<synchronous>, transform_indices = @transform_7, window_bounds = array<i64: 32, 32>}, {pipeline_mode = #tpu.pipeline_mode<synchronous>, transform_indices = @transform_8, window_bounds = array<i64: 1, 32>}, {pipeline_mode = #tpu.pipeline_mode<synchronous>, transform_indices = @transform_9, window_bounds = array<i64: 32, 32>}, {pipeline_mode = #tpu.pipeline_mode<synchronous>, transform_indices = @transform_10, window_bounds = array<i64: 1, 32>}, {pipeline_mode = #tpu.pipeline_mode<synchronous>, transform_indices = @transform_11, window_bounds = array<i64: 1, 32>}, {pipeline_mode = #tpu.pipeline_mode<synchronous>, transform_indices = @transform_12, window_bounds = array<i64: 1, 32>}, {pipeline_mode = #tpu.pipeline_mode<synchronous>, transform_indices = @transform_13, window_bounds = array<i64: 1, 32>}, {pipeline_mode = #tpu.pipeline_mode<synchronous>, transform_indices = @transform_14, window_bounds = array<i64: 1, 32>}, {pipeline_mode = #tpu.pipeline_mode<synchronous>, transform_indices = @transform_15, window_bounds = array<i64: 32, 128>}, {pipeline_mode = #tpu.pipeline_mode<synchronous>, transform_indices = @transform_16, window_bounds = array<i64: 1, 128>}, {pipeline_mode = #tpu.pipeline_mode<synchronous>, transform_indices = @transform_17, window_bounds = array<i64: 32, 1>}, {pipeline_mode = #tpu.pipeline_mode<synchronous>, transform_indices = @transform_18, window_bounds = array<i64: 1, 1>}, {pipeline_mode = #tpu.pipeline_mode<synchronous>, transform_indices = @transform_19, window_bounds = array<i64: 1, 1>}, {transform_indices = @transform_20, window_bounds = array<i64: 2, 128>}, {transform_indices = @transform_21, window_bounds = array<i64: 2, 1>}]} {
    %c0 = arith.constant 0 : index
    %c0_0 = arith.constant 0 : index
    %0 = vector.load %arg1[%c0, %c0_0] : memref<2x32xf32, #tpu.memory_space<vmem>>, vector<2x32xf32>
    %c0_1 = arith.constant 0 : index
    %c0_2 = arith.constant 0 : index
    %1 = vector.load %arg2[%c0_1, %c0_2] : memref<2x32xf32, #tpu.memory_space<vmem>>, vector<2x32xf32>
    %c0_3 = arith.constant 0 : index
    %c0_4 = arith.constant 0 : index
    %c0_5 = arith.constant 0 : index
    %2 = vector.load %arg3[%c0_3, %c0_4, %c0_5] : memref<2x4x32xf32, #tpu.memory_space<vmem>>, vector<2x4x32xf32>
    %c0_6 = arith.constant 0 : index
    %c0_7 = arith.constant 0 : index
    %3 = vector.load %arg4[%c0_6, %c0_7] : memref<2x128xf32, #tpu.memory_space<vmem>>, vector<2x128xf32>
    %4 = arith.truncf %0 : vector<2x32xf32> to vector<2x32xbf16>
    %c0_8 = arith.constant 0 : index
    %c0_9 = arith.constant 0 : index
    %5 = vector.load %arg5[%c0_8, %c0_9] : memref<32x4xbf16, #tpu.memory_space<vmem>>, vector<32x4xbf16>
    %cst = arith.constant dense<0.000000e+00> : vector<2x4xf32>
    %6 = tpu.matmul %4, %5, %cst {dimension_numbers = #tpu.dot_dimension_numbers<[1], [0], [0], [1], [0, 0, 1, 1], [], []>} : vector<2x32xbf16>, vector<32x4xbf16>, vector<2x4xf32> -> vector<2x4xf32>
    %c0_10 = arith.constant 0 : index
    %c0_11 = arith.constant 0 : index
    %7 = vector.load %arg6[%c0_10, %c0_11] : memref<1x4xf32, #tpu.memory_space<vmem>>, vector<1x4xf32>
    %8 = vector.broadcast %7 : vector<1x4xf32> to vector<2x4xf32>
    %9 = arith.addf %6, %8 : vector<2x4xf32>
    %cst_12 = arith.constant dense<0xFF800000> : vector<2xf32>
    %10 = vector.multi_reduction <maximumf>, %9, %cst_12 [1] : vector<2x4xf32> to vector<2xf32>
    %11 = vector.shape_cast %10 : vector<2xf32> to vector<2x1xf32>
    %12 = vector.broadcast %11 : vector<2x1xf32> to vector<2x4xf32>
    %13 = arith.subf %9, %12 : vector<2x4xf32>
    %14 = math.exp %13 : vector<2x4xf32>
    %cst_13 = arith.constant dense<0.000000e+00> : vector<2xf32>
    %15 = vector.multi_reduction <add>, %14, %cst_13 [1] : vector<2x4xf32> to vector<2xf32>
    %16 = vector.shape_cast %15 : vector<2xf32> to vector<2x1xf32>
    %17 = tpu.reciprocal %16 {approx = true} : vector<2x1xf32> -> vector<2x1xf32>
    %18 = vector.broadcast %17 : vector<2x1xf32> to vector<2x4xf32>
    %19 = arith.mulf %14, %18 : vector<2x4xf32>
    %20 = vector.shape_cast %19 : vector<2x4xf32> to vector<2x4x1xf32>
    %21 = vector.broadcast %20 : vector<2x4x1xf32> to vector<2x4x32xf32>
    %22 = arith.mulf %21, %2 : vector<2x4x32xf32>
    %cst_14 = arith.constant dense<0.000000e+00> : vector<2x32xf32>
    %23 = vector.multi_reduction <add>, %22, %cst_14 [1] : vector<2x4x32xf32> to vector<2x32xf32>
    %24 = arith.truncf %1 : vector<2x32xf32> to vector<2x32xbf16>
    %c0_15 = arith.constant 0 : index
    %c0_16 = arith.constant 0 : index
    %25 = vector.load %arg7[%c0_15, %c0_16] : memref<32x32xbf16, #tpu.memory_space<vmem>>, vector<32x32xbf16>
    %cst_17 = arith.constant dense<0.000000e+00> : vector<2x32xf32>
    %26 = tpu.matmul %24, %25, %cst_17 {dimension_numbers = #tpu.dot_dimension_numbers<[1], [0], [0], [1], [0, 0, 1, 1], [], []>} : vector<2x32xbf16>, vector<32x32xbf16>, vector<2x32xf32> -> vector<2x32xf32>
    %27 = arith.truncf %23 : vector<2x32xf32> to vector<2x32xbf16>
    %c0_18 = arith.constant 0 : index
    %c0_19 = arith.constant 0 : index
    %28 = vector.load %arg8[%c0_18, %c0_19] : memref<32x32xbf16, #tpu.memory_space<vmem>>, vector<32x32xbf16>
    %cst_20 = arith.constant dense<0.000000e+00> : vector<2x32xf32>
    %29 = tpu.matmul %27, %28, %cst_20 {dimension_numbers = #tpu.dot_dimension_numbers<[1], [0], [0], [1], [0, 0, 1, 1], [], []>} : vector<2x32xbf16>, vector<32x32xbf16>, vector<2x32xf32> -> vector<2x32xf32>
    %30 = arith.addf %26, %29 : vector<2x32xf32>
    %c0_21 = arith.constant 0 : index
    %c0_22 = arith.constant 0 : index
    %31 = vector.load %arg9[%c0_21, %c0_22] : memref<1x32xf32, #tpu.memory_space<vmem>>, vector<1x32xf32>
    %32 = vector.broadcast %31 : vector<1x32xf32> to vector<2x32xf32>
    %33 = arith.addf %30, %32 : vector<2x32xf32>
    %c0_23 = arith.constant 0 : index
    %c0_24 = arith.constant 0 : index
    %34 = vector.load %arg10[%c0_23, %c0_24] : memref<32x32xbf16, #tpu.memory_space<vmem>>, vector<32x32xbf16>
    %cst_25 = arith.constant dense<0.000000e+00> : vector<2x32xf32>
    %35 = tpu.matmul %4, %34, %cst_25 {dimension_numbers = #tpu.dot_dimension_numbers<[1], [0], [0], [1], [0, 0, 1, 1], [], []>} : vector<2x32xbf16>, vector<32x32xbf16>, vector<2x32xf32> -> vector<2x32xf32>
    %c0_26 = arith.constant 0 : index
    %c0_27 = arith.constant 0 : index
    %36 = vector.load %arg11[%c0_26, %c0_27] : memref<1x32xf32, #tpu.memory_space<vmem>>, vector<1x32xf32>
    %37 = vector.broadcast %36 : vector<1x32xf32> to vector<2x32xf32>
    %38 = arith.addf %35, %37 : vector<2x32xf32>
    %39 = arith.subf %33, %38 : vector<2x32xf32>
    %40 = arith.mulf %39, %39 : vector<2x32xf32>
    %cst_28 = arith.constant 0.000000e+00 : f32
    %41 = vector.broadcast %cst_28 : f32 to vector<2x32xf32>
    %42 = arith.subf %41, %40 : vector<2x32xf32>
    %43 = arith.addf %33, %38 : vector<2x32xf32>
    %cst_29 = arith.constant 0.000000e+00 : f32
    %44 = vector.broadcast %cst_29 : f32 to vector<2x32xf32>
    %45 = arith.maximumf %43, %44 : vector<2x32xf32>
    %46 = arith.addf %42, %45 : vector<2x32xf32>
    %c0_30 = arith.constant 0 : index
    %c0_31 = arith.constant 0 : index
    %47 = vector.load %arg14[%c0_30, %c0_31] : memref<1x32xf32, #tpu.memory_space<vmem>>, vector<1x32xf32>
    %48 = vector.broadcast %47 : vector<1x32xf32> to vector<2x32xf32>
    %49 = arith.subf %46, %48 : vector<2x32xf32>
    %c0_32 = arith.constant 0 : index
    %c0_33 = arith.constant 0 : index
    %50 = vector.load %arg15[%c0_32, %c0_33] : memref<1x32xf32, #tpu.memory_space<vmem>>, vector<1x32xf32>
    %cst_34 = arith.constant 9.99999974E-6 : f32
    %51 = vector.broadcast %cst_34 : f32 to vector<1x32xf32>
    %52 = arith.addf %50, %51 : vector<1x32xf32>
    %53 = math.rsqrt %52 : vector<1x32xf32>
    %54 = vector.broadcast %53 : vector<1x32xf32> to vector<2x32xf32>
    %55 = arith.mulf %49, %54 : vector<2x32xf32>
    %c0_35 = arith.constant 0 : index
    %c0_36 = arith.constant 0 : index
    %56 = vector.load %arg12[%c0_35, %c0_36] : memref<1x32xf32, #tpu.memory_space<vmem>>, vector<1x32xf32>
    %57 = vector.broadcast %56 : vector<1x32xf32> to vector<2x32xf32>
    %58 = arith.mulf %55, %57 : vector<2x32xf32>
    %c0_37 = arith.constant 0 : index
    %c0_38 = arith.constant 0 : index
    %59 = vector.load %arg13[%c0_37, %c0_38] : memref<1x32xf32, #tpu.memory_space<vmem>>, vector<1x32xf32>
    %60 = vector.broadcast %59 : vector<1x32xf32> to vector<2x32xf32>
    %61 = arith.addf %58, %60 : vector<2x32xf32>
    %62 = arith.truncf %61 : vector<2x32xf32> to vector<2x32xbf16>
    %c0_39 = arith.constant 0 : index
    %c0_40 = arith.constant 0 : index
    %63 = vector.load %arg16[%c0_39, %c0_40] : memref<32x128xbf16, #tpu.memory_space<vmem>>, vector<32x128xbf16>
    %cst_41 = arith.constant dense<0.000000e+00> : vector<2x128xf32>
    %64 = tpu.matmul %62, %63, %cst_41 {dimension_numbers = #tpu.dot_dimension_numbers<[1], [0], [0], [1], [0, 0, 1, 1], [], []>} : vector<2x32xbf16>, vector<32x128xbf16>, vector<2x128xf32> -> vector<2x128xf32>
    %c0_42 = arith.constant 0 : index
    %c0_43 = arith.constant 0 : index
    %65 = vector.load %arg17[%c0_42, %c0_43] : memref<1x128xf32, #tpu.memory_space<vmem>>, vector<1x128xf32>
    %66 = vector.broadcast %65 : vector<1x128xf32> to vector<2x128xf32>
    %67 = arith.addf %64, %66 : vector<2x128xf32>
    %68 = tpu.iota {dimensions = array<i32: 1>} : vector<2x128xi32>
    %c10_i32 = arith.constant 10 : i32
    %69 = vector.broadcast %c10_i32 : i32 to vector<2x128xi32>
    %70 = arith.cmpi slt, %68, %69 : vector<2x128xi32>
    %cst_44 = arith.constant -1.000000e+30 : f32
    %71 = vector.broadcast %cst_44 : f32 to vector<2x128xf32>
    %72 = arith.select %70, %67, %71 : vector<2x128xi1>, vector<2x128xf32>
    %cst_45 = arith.constant dense<0xFF800000> : vector<2xf32>
    %73 = vector.multi_reduction <maximumf>, %72, %cst_45 [1] : vector<2x128xf32> to vector<2xf32>
    %74 = vector.shape_cast %73 : vector<2xf32> to vector<2x1xf32>
    %75 = vector.broadcast %74 : vector<2x1xf32> to vector<2x128xf32>
    %76 = arith.subf %72, %75 : vector<2x128xf32>
    %77 = math.exp %76 : vector<2x128xf32>
    %cst_46 = arith.constant dense<0.000000e+00> : vector<2xf32>
    %78 = vector.multi_reduction <add>, %77, %cst_46 [1] : vector<2x128xf32> to vector<2xf32>
    %79 = vector.shape_cast %78 : vector<2xf32> to vector<2x1xf32>
    %80 = tpu.reciprocal %79 {approx = true} : vector<2x1xf32> -> vector<2x1xf32>
    %81 = vector.broadcast %80 : vector<2x1xf32> to vector<2x128xf32>
    %82 = arith.mulf %77, %81 : vector<2x128xf32>
    %cst_47 = arith.constant 1.000000e-16 : f32
    %83 = vector.broadcast %cst_47 : f32 to vector<2x128xf32>
    %84 = arith.addf %82, %83 : vector<2x128xf32>
    %85 = math.log %84 : vector<2x128xf32>
    %c0_48 = arith.constant 0 : index
    %c0_49 = arith.constant 0 : index
    %86 = vector.load %arg18[%c0_48, %c0_49] : memref<32x1xbf16, #tpu.memory_space<vmem>>, vector<32x1xbf16>
    %cst_50 = arith.constant dense<0.000000e+00> : vector<2x1xf32>
    %87 = tpu.matmul %62, %86, %cst_50 {dimension_numbers = #tpu.dot_dimension_numbers<[1], [0], [0], [1], [0, 0, 1, 1], [], []>} : vector<2x32xbf16>, vector<32x1xbf16>, vector<2x1xf32> -> vector<2x1xf32>
    %c0_51 = arith.constant 0 : index
    %c0_52 = arith.constant 0 : index
    %88 = vector.load %arg19[%c0_51, %c0_52] : memref<1x1xf32, #tpu.memory_space<vmem>>, vector<1x1xf32>
    %89 = vector.broadcast %88 : vector<1x1xf32> to vector<2x1xf32>
    %90 = arith.addf %87, %89 : vector<2x1xf32>
    %cst_53 = arith.constant 0.000000e+00 : f32
    %91 = vector.broadcast %cst_53 : f32 to vector<2x1xf32>
    %92 = arith.maximumf %91, %90 : vector<2x1xf32>
    %93 = vector.broadcast %cst_53 : f32 to vector<2x1xf32>
    %94 = arith.subf %93, %90 : vector<2x1xf32>
    %95 = arith.cmpf one, %94, %94 : vector<2x1xf32>
    %96 = vector.broadcast %cst_53 : f32 to vector<2x1xf32>
    %97 = arith.addf %96, %90 : vector<2x1xf32>
    %98 = math.absf %94 : vector<2x1xf32>
    %cst_54 = arith.constant 0.000000e+00 : f32
    %99 = vector.broadcast %cst_54 : f32 to vector<2x1xf32>
    %100 = arith.subf %99, %98 : vector<2x1xf32>
    %101 = math.exp %100 : vector<2x1xf32>
    %102 = math.log1p %101 : vector<2x1xf32>
    %103 = arith.addf %92, %102 : vector<2x1xf32>
    %104 = arith.select %95, %97, %103 : vector<2x1xi1>, vector<2x1xf32>
    %c0_55 = arith.constant 0 : index
    %c0_56 = arith.constant 0 : index
    %105 = vector.load %arg20[%c0_55, %c0_56] : memref<1x1xf32, #tpu.memory_space<vmem>>, vector<1x1xf32>
    %cst_57 = arith.constant 0.000000e+00 : f32
    %106 = vector.broadcast %cst_57 : f32 to vector<1x1xf32>
    %107 = arith.subf %106, %105 : vector<1x1xf32>
    %108 = math.exp %107 : vector<1x1xf32>
    %cst_58 = arith.constant 1.000000e+00 : f32
    %109 = vector.broadcast %cst_58 : f32 to vector<1x1xf32>
    %110 = arith.addf %109, %108 : vector<1x1xf32>
    %cst_59 = arith.constant 1.000000e+00 : f32
    %111 = vector.broadcast %cst_59 : f32 to vector<1x1xf32>
    %112 = arith.divf %111, %110 : vector<1x1xf32>
    %113 = vector.broadcast %112 : vector<1x1xf32> to vector<2x128xf32>
    %114 = arith.addf %3, %113 : vector<2x128xf32>
    %cst_60 = arith.constant 1.000000e-16 : f32
    %115 = vector.broadcast %cst_60 : f32 to vector<2x128xf32>
    %116 = arith.addf %114, %115 : vector<2x128xf32>
    %117 = math.log %116 : vector<2x128xf32>
    %118 = vector.broadcast %104 : vector<2x1xf32> to vector<2x128xf32>
    %119 = arith.mulf %118, %117 : vector<2x128xf32>
    %cst_61 = arith.constant -1.000000e+30 : f32
    %120 = vector.broadcast %cst_61 : f32 to vector<2x128xf32>
    %121 = arith.select %70, %119, %120 : vector<2x128xi1>, vector<2x128xf32>
    %122 = arith.addf %85, %121 : vector<2x128xf32>
    %cst_62 = arith.constant -1.000000e+30 : f32
    %123 = vector.broadcast %cst_62 : f32 to vector<2x128xf32>
    %124 = arith.select %70, %122, %123 : vector<2x128xi1>, vector<2x128xf32>
    %cst_63 = arith.constant dense<0xFF800000> : vector<2xf32>
    %125 = vector.multi_reduction <maximumf>, %124, %cst_63 [1] : vector<2x128xf32> to vector<2xf32>
    %126 = vector.shape_cast %125 : vector<2xf32> to vector<2x1xf32>
    %127 = vector.broadcast %126 : vector<2x1xf32> to vector<2x128xf32>
    %128 = arith.subf %124, %127 : vector<2x128xf32>
    %129 = math.exp %128 : vector<2x128xf32>
    %cst_64 = arith.constant dense<0.000000e+00> : vector<2xf32>
    %130 = vector.multi_reduction <add>, %129, %cst_64 [1] : vector<2x128xf32> to vector<2xf32>
    %131 = vector.shape_cast %130 : vector<2xf32> to vector<2x1xf32>
    %132 = tpu.reciprocal %131 {approx = true} : vector<2x1xf32> -> vector<2x1xf32>
    %133 = vector.broadcast %132 : vector<2x1xf32> to vector<2x128xf32>
    %134 = arith.mulf %129, %133 : vector<2x128xf32>
    %c0_65 = arith.constant 0 : index
    %c0_66 = arith.constant 0 : index
    %135 = vector.load %arg21[%c0_65, %c0_66] : memref<2x128xf32, #tpu.memory_space<vmem>>, vector<2x128xf32>
    tpu.vector_store %arg21[%c0_65, %c0_66], %134 {strides = array<i32>} : memref<2x128xf32, #tpu.memory_space<vmem>>, vector<2x128xf32>,
    %cst_67 = arith.constant dense<0xFF800000> : vector<2xf32>
    %136 = vector.multi_reduction <maximumf>, %121, %cst_67 [1] : vector<2x128xf32> to vector<2xf32>
    %137 = vector.shape_cast %136 : vector<2xf32> to vector<2x1xf32>
    %138 = vector.broadcast %137 : vector<2x1xf32> to vector<2x128xf32>
    %139 = arith.subf %121, %138 : vector<2x128xf32>
    %140 = math.exp %139 : vector<2x128xf32>
    %cst_68 = arith.constant dense<0.000000e+00> : vector<2xf32>
    %141 = vector.multi_reduction <add>, %140, %cst_68 [1] : vector<2x128xf32> to vector<2xf32>
    %142 = vector.shape_cast %141 : vector<2xf32> to vector<2x1xf32>
    %143 = tpu.reciprocal %142 {approx = true} : vector<2x1xf32> -> vector<2x1xf32>
    %144 = vector.broadcast %143 : vector<2x1xf32> to vector<2x128xf32>
    %145 = arith.mulf %140, %144 : vector<2x128xf32>
    %cst_69 = arith.constant 1.000000e-16 : f32
    %146 = vector.broadcast %cst_69 : f32 to vector<2x128xf32>
    %147 = arith.addf %145, %146 : vector<2x128xf32>
    %148 = math.log %147 : vector<2x128xf32>
    %149 = arith.mulf %145, %148 : vector<2x128xf32>
    %cst_70 = arith.constant 0.000000e+00 : f32
    %150 = vector.broadcast %cst_70 : f32 to vector<2x128xf32>
    %151 = arith.select %70, %149, %150 : vector<2x128xi1>, vector<2x128xf32>
    %cst_71 = arith.constant dense<0.000000e+00> : vector<2xf32>
    %152 = vector.multi_reduction <add>, %151, %cst_71 [1] : vector<2x128xf32> to vector<2xf32>
    %153 = vector.shape_cast %152 : vector<2xf32> to vector<2x1xf32>
    %cst_72 = arith.constant 0.000000e+00 : f32
    %154 = vector.broadcast %cst_72 : f32 to vector<2x1xf32>
    %155 = arith.subf %154, %153 : vector<2x1xf32>
    %c0_73 = arith.constant 0 : index
    %c0_74 = arith.constant 0 : index
    %156 = vector.load %arg22[%c0_73, %c0_74] : memref<2x1xf32, #tpu.memory_space<vmem>>, vector<2x1xf32>
    tpu.vector_store %arg22[%c0_73, %c0_74], %155 {strides = array<i32>} : memref<2x1xf32, #tpu.memory_space<vmem>>, vector<2x1xf32>,
    return
  }
  func.func @transform_0(%arg0: i32) -> (i32, i32) {
    %c0_i32 = arith.constant 0 : i32
    %c0_i32_0 = arith.constant 0 : i32
    return %arg0, %c0_i32 : i32, i32
  }
  func.func @transform_1(%arg0: i32) -> (i32, i32) {
    %c0_i32 = arith.constant 0 : i32
    %c0_i32_0 = arith.constant 0 : i32
    return %arg0, %c0_i32 : i32, i32
  }
  func.func @transform_2(%arg0: i32) -> (i32, i32, i32) {
    %c0_i32 = arith.constant 0 : i32
    %c0_i32_0 = arith.constant 0 : i32
    %c0_i32_1 = arith.constant 0 : i32
    return %arg0, %c0_i32, %c0_i32_0 : i32, i32, i32
  }
  func.func @transform_3(%arg0: i32) -> (i32, i32) {
    %c0_i32 = arith.constant 0 : i32
    %c0_i32_0 = arith.constant 0 : i32
    return %arg0, %c0_i32 : i32, i32
  }
  func.func @transform_4(%arg0: i32) -> (i32, i32) {
    %c0_i32 = arith.constant 0 : i32
    %c0_i32_0 = arith.constant 0 : i32
    %c0_i32_1 = arith.constant 0 : i32
    return %c0_i32, %c0_i32_0 : i32, i32
  }
  func.func @transform_5(%arg0: i32) -> (i32, i32) {
    %c0_i32 = arith.constant 0 : i32
    %c0_i32_0 = arith.constant 0 : i32
    %c0_i32_1 = arith.constant 0 : i32
    return %c0_i32, %c0_i32_0 : i32, i32
  }
  func.func @transform_6(%arg0: i32) -> (i32, i32) {
    %c0_i32 = arith.constant 0 : i32
    %c0_i32_0 = arith.constant 0 : i32
    %c0_i32_1 = arith.constant 0 : i32
    return %c0_i32, %c0_i32_0 : i32, i32
  }
  func.func @transform_7(%arg0: i32) -> (i32, i32) {
    %c0_i32 = arith.constant 0 : i32
    %c0_i32_0 = arith.constant 0 : i32
    %c0_i32_1 = arith.constant 0 : i32
    return %c0_i32, %c0_i32_0 : i32, i32
  }
  func.func @transform_8(%arg0: i32) -> (i32, i32) {
    %c0_i32 = arith.constant 0 : i32
    %c0_i32_0 = arith.constant 0 : i32
    %c0_i32_1 = arith.constant 0 : i32
    return %c0_i32, %c0_i32_0 : i32, i32
  }
  func.func @transform_9(%arg0: i32) -> (i32, i32) {
    %c0_i32 = arith.constant 0 : i32
    %c0_i32_0 = arith.constant 0 : i32
    %c0_i32_1 = arith.constant 0 : i32
    return %c0_i32, %c0_i32_0 : i32, i32
  }
  func.func @transform_10(%arg0: i32) -> (i32, i32) {
    %c0_i32 = arith.constant 0 : i32
    %c0_i32_0 = arith.constant 0 : i32
    %c0_i32_1 = arith.constant 0 : i32
    return %c0_i32, %c0_i32_0 : i32, i32
  }
  func.func @transform_11(%arg0: i32) -> (i32, i32) {
    %c0_i32 = arith.constant 0 : i32
    %c0_i32_0 = arith.constant 0 : i32
    %c0_i32_1 = arith.constant 0 : i32
    return %c0_i32, %c0_i32_0 : i32, i32
  }
  func.func @transform_12(%arg0: i32) -> (i32, i32) {
    %c0_i32 = arith.constant 0 : i32
    %c0_i32_0 = arith.constant 0 : i32
    %c0_i32_1 = arith.constant 0 : i32
    return %c0_i32, %c0_i32_0 : i32, i32
  }
  func.func @transform_13(%arg0: i32) -> (i32, i32) {
    %c0_i32 = arith.constant 0 : i32
    %c0_i32_0 = arith.constant 0 : i32
    %c0_i32_1 = arith.constant 0 : i32
    return %c0_i32, %c0_i32_0 : i32, i32
  }
  func.func @transform_14(%arg0: i32) -> (i32, i32) {
    %c0_i32 = arith.constant 0 : i32
    %c0_i32_0 = arith.constant 0 : i32
    %c0_i32_1 = arith.constant 0 : i32
    return %c0_i32, %c0_i32_0 : i32, i32
  }
  func.func @transform_15(%arg0: i32) -> (i32, i32) {
    %c0_i32 = arith.constant 0 : i32
    %c0_i32_0 = arith.constant 0 : i32
    %c0_i32_1 = arith.constant 0 : i32
    return %c0_i32, %c0_i32_0 : i32, i32
  }
  func.func @transform_16(%arg0: i32) -> (i32, i32) {
    %c0_i32 = arith.constant 0 : i32
    %c0_i32_0 = arith.constant 0 : i32
    %c0_i32_1 = arith.constant 0 : i32
    return %c0_i32, %c0_i32_0 : i32, i32
  }
  func.func @transform_17(%arg0: i32) -> (i32, i32) {
    %c0_i32 = arith.constant 0 : i32
    %c0_i32_0 = arith.constant 0 : i32
    %c0_i32_1 = arith.constant 0 : i32
    return %c0_i32, %c0_i32_0 : i32, i32
  }
  func.func @transform_18(%arg0: i32) -> (i32, i32) {
    %c0_i32 = arith.constant 0 : i32
    %c0_i32_0 = arith.constant 0 : i32
    %c0_i32_1 = arith.constant 0 : i32
    return %c0_i32, %c0_i32_0 : i32, i32
  }
  func.func @transform_19(%arg0: i32) -> (i32, i32) {
    %c0_i32 = arith.constant 0 : i32
    %c0_i32_0 = arith.constant 0 : i32
    %c0_i32_1 = arith.constant 0 : i32
    return %c0_i32, %c0_i32_0 : i32, i32
  }
  func.func @transform_20(%arg0: i32) -> (i32, i32) {
    %c0_i32 = arith.constant 0 : i32
    %c0_i32_0 = arith.constant 0 : i32
    return %arg0, %c0_i32 : i32, i32
  }
  func.func @transform_21(%arg0: i32) -> (i32, i32) {
    %c0_i32 = arith.constant 0 : i32
    %c0_i32_0 = arith.constant 0 : i32
    return %arg0, %c0_i32 : i32, i32
  }
}

module attributes {stable_mosaic.version = 11 : i64} {
  func.func @vision_graph_kernel(%arg0: i32, %arg1: memref<2x16x8xf32, #tpu.memory_space<vmem>>, %arg2: memref<16x8xbf16, #tpu.memory_space<vmem>>, %arg3: memref<8x16xbf16, #tpu.memory_space<vmem>>, %arg4: memref<8x16xbf16, #tpu.memory_space<vmem>>, %arg5: memref<2x16x8xf32, #tpu.memory_space<vmem>>, %arg6: memref<2x8x8xf32, #tpu.memory_space<vmem>>, %arg7: memref<2x8x128xf32, #tpu.memory_space<vmem>>) attributes {dimension_semantics = [#tpu.dimension_semantics<parallel>], iteration_bounds = array<i64: 1>, scalar_prefetch = 0 : i64, scratch_operands = 0 : i64, tpu.core_type = #tpu.core_type<tc>, window_params = [{transform_indices = @transform_0, window_bounds = array<i64: 2, 16, 8>}, {pipeline_mode = #tpu.pipeline_mode<synchronous>, transform_indices = @transform_1, window_bounds = array<i64: 16, 8>}, {pipeline_mode = #tpu.pipeline_mode<synchronous>, transform_indices = @transform_2, window_bounds = array<i64: 8, 16>}, {pipeline_mode = #tpu.pipeline_mode<synchronous>, transform_indices = @transform_3, window_bounds = array<i64: 8, 16>}, {transform_indices = @transform_4, window_bounds = array<i64: 2, 16, 8>}, {transform_indices = @transform_5, window_bounds = array<i64: 2, 8, 8>}, {transform_indices = @transform_6, window_bounds = array<i64: 2, 8, 128>}]} {
    %c0 = arith.constant 0 : index
    %c0_0 = arith.constant 0 : index
    %c0_1 = arith.constant 0 : index
    %0 = vector.load %arg1[%c0, %c0_0, %c0_1] : memref<2x16x8xf32, #tpu.memory_space<vmem>>, vector<2x16x8xf32>
    %1 = arith.mulf %0, %0 : vector<2x16x8xf32>
    %cst = arith.constant dense<0.000000e+00> : vector<2x8xf32>
    %2 = vector.multi_reduction <add>, %1, %cst [1] : vector<2x16x8xf32> to vector<2x8xf32>
    %3 = vector.shape_cast %2 : vector<2x8xf32> to vector<2x1x8xf32>
    %4 = math.sqrt %3 : vector<2x1x8xf32>
    %cst_2 = arith.constant 9.99999996E-13 : f32
    %5 = vector.broadcast %cst_2 : f32 to vector<2x1x8xf32>
    %6 = arith.addf %4, %5 : vector<2x1x8xf32>
    %7 = vector.broadcast %6 : vector<2x1x8xf32> to vector<2x16x8xf32>
    %8 = arith.divf %0, %7 : vector<2x16x8xf32>
    %c0_3 = arith.constant 0 : index
    %c0_4 = arith.constant 0 : index
    %c0_5 = arith.constant 0 : index
    %9 = vector.load %arg5[%c0_3, %c0_4, %c0_5] : memref<2x16x8xf32, #tpu.memory_space<vmem>>, vector<2x16x8xf32>
    tpu.vector_store %arg5[%c0_3, %c0_4, %c0_5], %8 {strides = array<i32>} : memref<2x16x8xf32, #tpu.memory_space<vmem>>, vector<2x16x8xf32>,
    %10 = tpu.transpose %8, [0, 2, 1] : vector<2x16x8xf32> -> vector<2x8x16xf32>
    %11 = arith.truncf %10 : vector<2x8x16xf32> to vector<2x8x16xbf16>
    %12 = vector.shape_cast %11 : vector<2x8x16xbf16> to vector<16x16xbf16>
    %c0_6 = arith.constant 0 : index
    %c0_7 = arith.constant 0 : index
    %13 = vector.load %arg2[%c0_6, %c0_7] : memref<16x8xbf16, #tpu.memory_space<vmem>>, vector<16x8xbf16>
    %cst_8 = arith.constant dense<0.000000e+00> : vector<16x8xf32>
    %14 = tpu.matmul %12, %13, %cst_8 {dimension_numbers = #tpu.dot_dimension_numbers<[1], [0], [0], [1], [0, 0, 1, 1], [], []>} : vector<16x16xbf16>, vector<16x8xbf16>, vector<16x8xf32> -> vector<16x8xf32>
    %15 = vector.shape_cast %14 : vector<16x8xf32> to vector<2x8x8xf32>
    %c0_9 = arith.constant 0 : index
    %c0_10 = arith.constant 0 : index
    %c0_11 = arith.constant 0 : index
    %16 = vector.load %arg6[%c0_9, %c0_10, %c0_11] : memref<2x8x8xf32, #tpu.memory_space<vmem>>, vector<2x8x8xf32>
    tpu.vector_store %arg6[%c0_9, %c0_10, %c0_11], %15 {strides = array<i32>} : memref<2x8x8xf32, #tpu.memory_space<vmem>>, vector<2x8x8xf32>,
    %17 = arith.truncf %14 : vector<16x8xf32> to vector<16x8xbf16>
    %c0_12 = arith.constant 0 : index
    %c0_13 = arith.constant 0 : index
    %18 = vector.load %arg3[%c0_12, %c0_13] : memref<8x16xbf16, #tpu.memory_space<vmem>>, vector<8x16xbf16>
    %cst_14 = arith.constant dense<0.000000e+00> : vector<16x16xf32>
    %19 = tpu.matmul %17, %18, %cst_14 {dimension_numbers = #tpu.dot_dimension_numbers<[1], [0], [0], [1], [0, 0, 1, 1], [], []>} : vector<16x8xbf16>, vector<8x16xbf16>, vector<16x16xf32> -> vector<16x16xf32>
    %20 = vector.shape_cast %19 : vector<16x16xf32> to vector<2x8x16xf32>
    %c0_15 = arith.constant 0 : index
    %c0_16 = arith.constant 0 : index
    %21 = vector.load %arg4[%c0_15, %c0_16] : memref<8x16xbf16, #tpu.memory_space<vmem>>, vector<8x16xbf16>
    %cst_17 = arith.constant dense<0.000000e+00> : vector<16x16xf32>
    %22 = tpu.matmul %17, %21, %cst_17 {dimension_numbers = #tpu.dot_dimension_numbers<[1], [0], [0], [1], [0, 0, 1, 1], [], []>} : vector<16x8xbf16>, vector<8x16xbf16>, vector<16x16xf32> -> vector<16x16xf32>
    %23 = vector.shape_cast %22 : vector<16x16xf32> to vector<2x8x16xf32>
    %24 = vector.extract_strided_slice %20 {offsets = [0, 0, 0], sizes = [2, 1, 16], strides = [1, 1, 1]} : vector<2x8x16xf32> to vector<2x1x16xf32>
    %25 = vector.broadcast %24 : vector<2x1x16xf32> to vector<2x8x16xf32>
    %26 = arith.addf %23, %25 : vector<2x8x16xf32>
    %27 = vector.extract_strided_slice %20 {offsets = [0, 1, 0], sizes = [2, 1, 16], strides = [1, 1, 1]} : vector<2x8x16xf32> to vector<2x1x16xf32>
    %28 = vector.broadcast %27 : vector<2x1x16xf32> to vector<2x8x16xf32>
    %29 = arith.addf %23, %28 : vector<2x8x16xf32>
    %30 = vector.extract_strided_slice %20 {offsets = [0, 2, 0], sizes = [2, 1, 16], strides = [1, 1, 1]} : vector<2x8x16xf32> to vector<2x1x16xf32>
    %31 = vector.broadcast %30 : vector<2x1x16xf32> to vector<2x8x16xf32>
    %32 = arith.addf %23, %31 : vector<2x8x16xf32>
    %33 = vector.extract_strided_slice %20 {offsets = [0, 3, 0], sizes = [2, 1, 16], strides = [1, 1, 1]} : vector<2x8x16xf32> to vector<2x1x16xf32>
    %34 = vector.broadcast %33 : vector<2x1x16xf32> to vector<2x8x16xf32>
    %35 = arith.addf %23, %34 : vector<2x8x16xf32>
    %36 = vector.extract_strided_slice %20 {offsets = [0, 4, 0], sizes = [2, 1, 16], strides = [1, 1, 1]} : vector<2x8x16xf32> to vector<2x1x16xf32>
    %37 = vector.broadcast %36 : vector<2x1x16xf32> to vector<2x8x16xf32>
    %38 = arith.addf %23, %37 : vector<2x8x16xf32>
    %39 = vector.extract_strided_slice %20 {offsets = [0, 5, 0], sizes = [2, 1, 16], strides = [1, 1, 1]} : vector<2x8x16xf32> to vector<2x1x16xf32>
    %40 = vector.broadcast %39 : vector<2x1x16xf32> to vector<2x8x16xf32>
    %41 = arith.addf %23, %40 : vector<2x8x16xf32>
    %42 = vector.extract_strided_slice %20 {offsets = [0, 6, 0], sizes = [2, 1, 16], strides = [1, 1, 1]} : vector<2x8x16xf32> to vector<2x1x16xf32>
    %43 = vector.broadcast %42 : vector<2x1x16xf32> to vector<2x8x16xf32>
    %44 = arith.addf %23, %43 : vector<2x8x16xf32>
    %45 = vector.extract_strided_slice %20 {offsets = [0, 7, 0], sizes = [2, 1, 16], strides = [1, 1, 1]} : vector<2x8x16xf32> to vector<2x1x16xf32>
    %46 = vector.broadcast %45 : vector<2x1x16xf32> to vector<2x8x16xf32>
    %47 = arith.addf %23, %46 : vector<2x8x16xf32>
    %48 = tpu.concatenate %26, %29, %32, %35, %38, %41, %44, %47 in 2 : vector<2x8x16xf32>, vector<2x8x16xf32>, vector<2x8x16xf32>, vector<2x8x16xf32>, vector<2x8x16xf32>, vector<2x8x16xf32>, vector<2x8x16xf32>, vector<2x8x16xf32> -> vector<2x8x128xf32>
    %c0_18 = arith.constant 0 : index
    %c0_19 = arith.constant 0 : index
    %c0_20 = arith.constant 0 : index
    %49 = vector.load %arg7[%c0_18, %c0_19, %c0_20] : memref<2x8x128xf32, #tpu.memory_space<vmem>>, vector<2x8x128xf32>
    tpu.vector_store %arg7[%c0_18, %c0_19, %c0_20], %48 {strides = array<i32>} : memref<2x8x128xf32, #tpu.memory_space<vmem>>, vector<2x8x128xf32>,
    return
  }
  func.func @transform_0(%arg0: i32) -> (i32, i32, i32) {
    %c0_i32 = arith.constant 0 : i32
    %c0_i32_0 = arith.constant 0 : i32
    %c0_i32_1 = arith.constant 0 : i32
    return %arg0, %c0_i32, %c0_i32_0 : i32, i32, i32
  }
  func.func @transform_1(%arg0: i32) -> (i32, i32) {
    %c0_i32 = arith.constant 0 : i32
    %c0_i32_0 = arith.constant 0 : i32
    %c0_i32_1 = arith.constant 0 : i32
    return %c0_i32, %c0_i32_0 : i32, i32
  }
  func.func @transform_2(%arg0: i32) -> (i32, i32) {
    %c0_i32 = arith.constant 0 : i32
    %c0_i32_0 = arith.constant 0 : i32
    %c0_i32_1 = arith.constant 0 : i32
    return %c0_i32, %c0_i32_0 : i32, i32
  }
  func.func @transform_3(%arg0: i32) -> (i32, i32) {
    %c0_i32 = arith.constant 0 : i32
    %c0_i32_0 = arith.constant 0 : i32
    %c0_i32_1 = arith.constant 0 : i32
    return %c0_i32, %c0_i32_0 : i32, i32
  }
  func.func @transform_4(%arg0: i32) -> (i32, i32, i32) {
    %c0_i32 = arith.constant 0 : i32
    %c0_i32_0 = arith.constant 0 : i32
    %c0_i32_1 = arith.constant 0 : i32
    return %arg0, %c0_i32, %c0_i32_0 : i32, i32, i32
  }
  func.func @transform_5(%arg0: i32) -> (i32, i32, i32) {
    %c0_i32 = arith.constant 0 : i32
    %c0_i32_0 = arith.constant 0 : i32
    %c0_i32_1 = arith.constant 0 : i32
    return %arg0, %c0_i32, %c0_i32_0 : i32, i32, i32
  }
  func.func @transform_6(%arg0: i32) -> (i32, i32, i32) {
    %c0_i32 = arith.constant 0 : i32
    %c0_i32_0 = arith.constant 0 : i32
    %c0_i32_1 = arith.constant 0 : i32
    return %arg0, %c0_i32, %c0_i32_0 : i32, i32, i32
  }
}

</mosaic_0001>

<bundles_post_ra>
// kernel: poem_lmh_forward.2
= control target key start
LH: loop header
LB: loop body
LE: loop exit
PB: predicated region body
PF: predicated region fallthrough
CT: control target
= control target key end

     0   :  { %vm30_vm0 = vcmask 64512   ;;  %s722_s0 = inlined_call_operand.vmem [shape: f32[2,16,8], index: 0, kind: input, shape index: {}]   ;;  %s723_s1 = inlined_call_operand.vmem [shape: bf16[16,8], index: 1, kind: input, shape index: {}]   ;;  %s724_s2 = inlined_call_operand.vmem [shape: bf16[8,16], index: 2, kind: input, shape index: {}]   ;;  %s725_s3 = inlined_call_operand.vmem [shape: bf16[8,16], index: 3, kind: input, shape index: {}]   ;;  %s726_s4 = inlined_call_operand.vmem [shape: f32[2,16,8], index: 4, kind: output, shape index: {0}]   ;;  %s727_s5 = inlined_call_operand.hbm [shape: f32[2,8,8], index: 5, kind: output, shape index: {1}]   ;;  %s728_s6 = inlined_call_operand.vmem [shape: f32[2,8,128], index: 6, kind: output, shape index: {2}]  }
   0x1   :  { %v22_v0 = vld [vmem:[%s722_s0] sm:$0xff]  ;;  %v23_v1 = vld [vmem:[%s722_s0 + $0x8] sm:$0xff]  ;;  %v24_v2 = vld [vmem:[%s722_s0 + $0x10] sm:$0xff] }
   0x2   :  { %v25_v3 = vld [vmem:[%s722_s0 + $0x18] sm:$0xff]  ;;  %v26_v4 = vmul.f32 %v22_v0, %v22_v0  ;;  %v27_v5 = vmul.f32 %v23_v1, %v23_v1  ;;  %v28_v6 = vmul.f32 %v24_v2, %v24_v2 }
   0x3   :  { %v29_v7 = vmul.f32 %v25_v3, %v25_v3 }
   0x4   :  { %12 = vsyncpa [#allocation3], 0  ;;  %v31_v8 = vsel %vm30_vm0, %v26_v4, 0.0  ;;  %v32_v9 = vsel %vm30_vm0, %v27_v5, 0.0  ;;  %v40_v10 = vsel %vm30_vm0, %v28_v6, 0.0  ;;  %v529_v44 = vld [vmem:[%s723_s1] sm:$0xff]   ;;  %v296_v61 = vlaneseq }
   0x5   :  { %v33_v11 = vadd.f32 %v32_v9, %v31_v8  ;;  %v41_v12 = vsel %vm30_vm0, %v29_v7, 0.0  ;;  %v560_v45 = vmov 0.0   ;;  %vm561_vm5 = vmmov 0   ;;  %v251_v52 = vld [vmem:[%s725_s3] sm:$0xf]  ;;  %s563_s3 = smov 16  }
   0x6   :  { %v42_v13 = vadd.f32 %v41_v12, %v40_v10  ;;  %490 = vmatprep.subr.bf16.mxu0 %v560_v45  ;;  %496 = vmatprep.subr.bf16.mxu1 %v560_v45  ;;  %vm154_vm6 = vcmask 130048   ;;  %vm206_vm7 = vcmask 1043456   ;;  %v202_v54 = vld [vmem:[%s724_s2] sm:$0xf]  ;;  %v653_v62 = vshrl.u32 %v296_v61, 7  ;;  %s562_s2 = smov 32  }
   0x7   :  { %v34_v14 = vrot.slane %v33_v11, 4  ;;  %491 = vmatpush3.bf16.msra.mxu0 %v529_v44  ;;  %492 = vmatprep.mubr.msk.bf16.mxu0 %vm561_vm5, %v560_v45  ;;  %v253_v53 = vsel %vm206_vm7, %v251_v52, 0  ;;  %v208_v55 = vsel %vm206_vm7, %v202_v54, 0  ;;  %s564_s16 = smov 48   ;;  %s565_s17 = smov 64  }
   0x8   :  { %v43_v15 = vrot.slane %v42_v13, 4  ;;  %502 = vmatprep.subr.bf16.mxu0 %v560_v45  ;;  %498 = vmatprep.mubr.msk.bf16.mxu1 %vm561_vm5, %v560_v45  ;;  %v318_v63 = vsub.s32 2, %v653_v62  ;;  %s566_s18 = smov 80   ;;  %s567_s19 = smov 96  }
   0x9   :  { %v35_v16 = vadd.f32 %v34_v14, %v33_v11  ;;  %497 = vmatpush3.bf16.msra.mxu1 %v208_v55  ;;  %s568_s20 = smov 112   ;;  %s569_s21 = smov [#allocation2]  }
   0xa   :  { %v44_v17 = vadd.f32 %v43_v15, %v42_v13  ;;  %v338_v13 = vsub.s32 4, %v653_v62  ;;  %s461_s22 = sshll.u32 %s569_s21, 4  ;;  %s462_s22 = int_to_ptr.vmem [resolvable:$true] %s461_s22 }
   0xb   :  { %v36_v18 = vrot.slane %v35_v16, 2  ;;  %s538_s23 = scalar_lea.vmem %s462_s22, 256  ;;  %p543_p1 = scmp.lt.s32.totalorder %s462_s22, %s462_s22 }
   0xc   :  { %v45_v19 = vrot.slane %v44_v17, 2  ;;  %p539_p0 = scmp.ne.s32.totalorder %s462_s22, %s538_s23  ;;  %p544_p2 = scmp.lt.s32.totalorder %s538_s23, %s538_s23 }
   0xd   :  { %v37_v20 = vadd.f32 %v36_v18, %v35_v16 }
   0xe   :  { %v46_v21 = vadd.f32 %v45_v19, %v44_v17  ;;  %p545_p3 = por %p544_p2, %p543_p1 }
   0xf   :  { %v38_v22 = vrot.slane %v37_v20, 1 }
  0x10   :  { %v47_v23 = vrot.slane %v46_v21, 1  ;;  %p546_p4 = pnand %p545_p3, %p539_p0 }
  0x11   :  { %v39_v24 = vadd.f32 %v38_v22, %v37_v20 }
  0x12   :  { %v48_v25 = vadd.f32 %v47_v23, %v46_v21  ;;  %v348_v21 = vsub.s32 5, %v653_v62 }
  0x13   :  { %530 = vrsqrt.f32 %v39_v24  ;;  %vm51_vm1 = vcmp.eq.f32.partialorder %v39_v24, inf  ;;  %v54_v27 = vand.u32 2147483648, %v39_v24  ;;  %vm53_vm2 = vcmp.eq.f32.partialorder %v39_v24, 0.0 }
  0x14   :  { %532 = vrsqrt.f32 %v48_v25  ;;  %vm58_vm3 = vcmp.eq.f32.partialorder %v48_v25, inf  ;;  %v61_v30 = vand.u32 2147483648, %v48_v25  ;;  %vm60_vm4 = vcmp.eq.f32.partialorder %v48_v25, 0.0 }
  0x20   :  { %v531_v26 = vpop.eup %530 }
  0x21   :  { %v533_v28 = vpop.eup %532  ;;  %v50_v29 = vmul.f32 %v531_v26, %v39_v24  ;;  %v358_v26 = vsub.s32 6, %v653_v62 }
  0x22   :  { %v57_v31 = vmul.f32 %v533_v28, %v48_v25 }
  0x23   :  { %v52_v32 = vsel %vm51_vm1, %v39_v24, %v50_v29  ;;  %v368_v29 = vsub.s32 7, %v653_v62 }
  0x24   :  { %v55_v33 = vsel %vm53_vm2, %v54_v27, %v52_v32  ;;  %v59_v34 = vsel %vm58_vm3, %v48_v25, %v57_v31 }
  0x25   :  { %v62_v35 = vsel %vm60_vm4, %v61_v30, %v59_v34  ;;  %v63_v36 = vadd.f32 1e-12, %v55_v33 }
  0x26   :  { %v64_v37 = vadd.f32 1e-12, %v62_v35 }
  0x27   :  { %534 = vrcp.f32 %v63_v36 }
  0x28   :  { %536 = vrcp.f32 %v64_v37 }
  0x34   :  { %v535_v38 = vpop.eup %534 }
  0x35   :  { %v537_v39 = vpop.eup %536  ;;  %v66_v40 = vmul.f32 %v535_v38, %v22_v0  ;;  %v67_v41 = vmul.f32 %v535_v38, %v23_v1  ;;  %v308_v0 = vsub.s32 1, %v653_v62  ;;  %v298_v1 = vsub.s32 0, %v653_v62 }
  0x36   :  { %v69_v42 = vmul.f32 %v537_v39, %v24_v2  ;;  %v70_v43 = vmul.f32 %v537_v39, %v25_v3  ;;  %v328_v2 = vsub.s32 3, %v653_v62 }
  0x37   :  { %71 = vst.msk [vmem:[%s726_s4] sm:$0xff] %vm30_vm0, %v66_v40  ;;  %72 = vst.msk [vmem:[%s726_s4 + $0x8] sm:$0xff] %vm30_vm0, %v67_v41 }
  0x38   :  { %73 = vst.msk [vmem:[%s726_s4 + $0x10] sm:$0xff] %vm30_vm0, %v69_v42  ;;  %v520_v46 = vpack.i.bf16 %v69_v42, %v66_v40  ;;  %74 = vst.msk [vmem:[%s726_s4 + $0x18] sm:$0xff] %vm30_vm0, %v70_v43  ;;  %v522_v47 = vpack.i.bf16 %v70_v43, %v67_v41 }
  0x3a   :  { %521 = vxpose.xlu0.b32.start [1/2] (short) (narrow) %v520_v46, 8 }
  0x3e   :  { %523 = vxpose.xlu0.b32.end [2/2] (short) (narrow) %v522_v47, 8 }
  0xb6   :  { %v524_v48 = vpop.trf.xlu0 }
  0xb7   :  { %v528_v49 = vunpack.i.h.bf16 %v524_v48  ;;  %v525_v50 = vunpack.i.l.bf16 %v524_v48 }
  0xb9   :  { %v483_v51 = vpack.c.bf16 %v528_v49, %v525_v50 }
  0xbb   :  { %493 = vmatmul.mubr.msk.bf16.vlgmr.msra.gmra.mxu0 %vm154_vm6, %v483_v51 }
  0xbc   :  { %504 = vmatprep.mubr.msk.bf16.mxu0 %vm561_vm5, %v560_v45  ;;  %503 = vmatpush3.bf16.msra.mxu0 %v253_v53 }
 0x17b   :  { %v192_v56 = vpop.f32.mrf.mxu0 }
 0x17c   :  { %199 = vst.msk [vmem:[#allocation2] sm:$0xff] %vm30_vm0, %v192_v56 }
 0x17d   :  { %v494_v57 = vpop.f32.mrf.mxu0 }
 0x17f   :  { %v195_v58 = vpop.f32.mrf.mxu0 }
 0x180   :  { %200 = vst.msk [vmem:[#allocation2 + $0x8] sm:$0xff] %vm30_vm0, %v195_v58  ;;  %v201_v59 = vpack.c.bf16 %v195_v58, %v192_v56 }
 0x181   :  { %v495_v60 = vpop.f32.mrf.mxu0 }
 0x182   :  { %499 = vmatmul.mubr.msk.bf16.vlgmr.msra.gmra.mxu1 %vm30_vm0, %v201_v59  ;;  %505 = vmatmul.mubr.msk.bf16.vlgmr.msra.gmra.mxu0 %vm30_vm0, %v201_v59 }
 0x242   :  { %v244_v3 = vpop.f32.mrf.mxu1  ;;  %v289_v4 = vpop.f32.mrf.mxu0 }
 0x243   :  { %v319_v5 = vrot.slane %v244_v3, %v318_v63  ;;  %v309_v6 = vrot.slane %v244_v3, %v308_v0  ;;  %v299_v9 = vrot.slane %v244_v3, %v298_v1  ;;  %v329_v12 = vrot.slane %v244_v3, %v328_v2 }
 0x244   :  { %v500_v7 = vpop.f32.mrf.mxu1  ;;  %v506_v8 = vpop.f32.mrf.mxu0  ;;  %v339_v20 = vrot.slane %v244_v3, %v338_v13  ;;  %v349_v25 = vrot.slane %v244_v3, %v348_v21  ;;  %v359_v28 = vrot.slane %v244_v3, %v358_v26  ;;  %v369_v31 = vrot.slane %v244_v3, %v368_v29 }
 0x245   :  { %v324_v10 = vadd.f32 %v319_v5, %v289_v4  ;;  %v314_v11 = vadd.f32 %v309_v6, %v289_v4  ;;  %v664_v16 = vadd.f32 %v299_v9, %v289_v4  ;;  %v334_v19 = vadd.f32 %v329_v12, %v289_v4 }
 0x246   :  { %v660_v14 = vpop.f32.mrf.mxu1  ;;  %v662_v15 = vpop.f32.mrf.mxu0  ;;  %v344_v24 = vadd.f32 %v339_v20, %v289_v4  ;;  %v354_v27 = vadd.f32 %v349_v25, %v289_v4  ;;  %v364_v30 = vadd.f32 %v359_v28, %v289_v4  ;;  %v374_v32 = vadd.f32 %v369_v31, %v289_v4 }
 0x247   :  { %386 = vrot.lane.b32.xlu0 %v324_v10, %s562_s2  ;;  %378 = vrot.lane.b32.xlu1 %v314_v11, %s563_s3  ;;  %v303_v22 = vrot.slane %v660_v14, %v298_v1  ;;  %v313_v33 = vrot.slane %v660_v14, %v308_v0  ;;  %v323_v35 = vrot.slane %v660_v14, %v318_v63 }
 0x248   :  { %v501_v17 = vpop.f32.mrf.mxu1  ;;  %v507_v18 = vpop.f32.mrf.mxu0  ;;  %v333_v37 = vrot.slane %v660_v14, %v328_v2  ;;  %v343_v39 = vrot.slane %v660_v14, %v338_v13  ;;  %v353_v41 = vrot.slane %v660_v14, %v348_v21  ;;  %v363_v43 = vrot.slane %v660_v14, %v358_v26 }
 0x249   :  { %v671_v23 = vadd.f32 %v303_v22, %v662_v15  ;;  %v315_v34 = vadd.f32 %v313_v33, %v662_v15  ;;  %v325_v36 = vadd.f32 %v323_v35, %v662_v15 }
 0x24a   :  { %v335_v38 = vadd.f32 %v333_v37, %v662_v15  ;;  %v345_v40 = vadd.f32 %v343_v39, %v662_v15  ;;  %v355_v42 = vadd.f32 %v353_v41, %v662_v15 }
 0x24b   :  { %394 = vrot.lane.b32.xlu1 %v334_v19, %s564_s16 }
 0x24f   :  { %402 = vrot.lane.b32.xlu1 %v344_v24, %s565_s17 }
 0x253   :  { %410 = vrot.lane.b32.xlu1 %v354_v27, %s566_s18 }
 0x257   :  { %418 = vrot.lane.b32.xlu1 %v364_v30, %s567_s19 }
 0x25b   :  { %426 = vrot.lane.b32.xlu1 %v374_v32, %s568_s20 }
 0x25f   :  { %380 = vrot.lane.b32.xlu1 %v315_v34, %s563_s3 }
 0x263   :  { %388 = vrot.lane.b32.xlu1 %v325_v36, %s562_s2 }
 0x267   :  { %396 = vrot.lane.b32.xlu1 %v335_v38, %s564_s16 }
 0x26b   :  { %404 = vrot.lane.b32.xlu1 %v345_v40, %s565_s17 }
 0x26c   :  { %549 = shalt.err (!%p546_p4)
}
 0x26d   :  { %s570_s24 = smov 128   ;;  %s571_s25 = smov 8   ;;  %v365_v44 = vadd.f32 %v363_v43, %v662_v15  ;;  %v373_v45 = vrot.slane %v660_v14, %v368_v29  ;;  %vm434_vm8 = vcmask 261120   ;;  %vm437_vm9 = vcmask 392192  }
 0x26e   :  { %467 = dma.vmem_to_hbm [thread:$0]  %s462_s22, 256, %s727_s5, [#allocation3], %s570_s24, %s570_s24, %s571_s25   ;;  %vm440_vm10 = vcmask 523264   ;;  %vm443_vm11 = vcmask 654336   ;;  %vm446_vm12 = vcmask 785408   ;;  %vm449_vm13 = vcmask 916480  }
 0x26f   :  { %412 = vrot.lane.b32.xlu1 %v355_v42, %s566_s18  ;;  %v375_v46 = vadd.f32 %v373_v45, %v662_v15 }
 0x273   :  { %420 = vrot.lane.b32.xlu1 %v365_v44, %s567_s19 }
 0x277   :  { %428 = vrot.lane.b32.xlu1 %v375_v46, %s568_s20 }
 0x2b9   :  { %v379_v47 = vpop.permute.xlu1 %378  ;;  %v387_v51 = vpop.permute.xlu0 %386 }
 0x2ba   :  { %v432_v52 = vsel %vm154_vm6, %v664_v16, %v379_v47 }
 0x2bb   :  { %v435_v53 = vsel %vm434_vm8, %v432_v52, %v387_v51 }
 0x2bd   :  { %v395_v48 = vpop.permute.xlu1 %394 }
 0x2be   :  { %v438_v55 = vsel %vm437_vm9, %v435_v53, %v395_v48 }
 0x2c1   :  { %v403_v49 = vpop.permute.xlu1 %402 }
 0x2c2   :  { %v441_v56 = vsel %vm440_vm10, %v438_v55, %v403_v49 }
 0x2c5   :  { %v411_v50 = vpop.permute.xlu1 %410 }
 0x2c6   :  { %v444_v57 = vsel %vm443_vm11, %v441_v56, %v411_v50 }
 0x2c9   :  { %v419_v54 = vpop.permute.xlu1 %418 }
 0x2ca   :  { %v447_v58 = vsel %vm446_vm12, %v444_v57, %v419_v54 }
 0x2cd   :  { %v427_v59 = vpop.permute.xlu1 %426 }
 0x2ce   :  { %v450_v60 = vsel %vm449_vm13, %v447_v58, %v427_v59 }
 0x2cf   :  { %452 = vst [vmem:[%s728_s6] sm:$0xff] %v450_v60 }
 0x2d1   :  { %v381_v61 = vpop.permute.xlu1 %380 }
 0x2d2   :  { %v433_v2 = vsel %vm154_vm6, %v671_v23, %v381_v61 }
 0x2d5   :  { %v389_v62 = vpop.permute.xlu1 %388 }
 0x2d6   :  { %v436_v3 = vsel %vm434_vm8, %v433_v2, %v389_v62 }
 0x2d9   :  { %v397_v63 = vpop.permute.xlu1 %396 }
 0x2da   :  { %v439_v5 = vsel %vm437_vm9, %v436_v3, %v397_v63 }
 0x2dd   :  { %v405_v0 = vpop.permute.xlu1 %404 }
 0x2de   :  { %v442_v6 = vsel %vm440_vm10, %v439_v5, %v405_v0 }
 0x2e1   :  { %v413_v1 = vpop.permute.xlu1 %412 }
 0x2e2   :  { %v445_v7 = vsel %vm443_vm11, %v442_v6, %v413_v1 }
 0x2e5   :  { %v421_v4 = vpop.permute.xlu1 %420 }
 0x2e6   :  { %v448_v8 = vsel %vm446_vm12, %v445_v7, %v421_v4 }
 0x2e9   :  { %v429_v9 = vpop.permute.xlu1 %428 }
 0x2ea   :  { %v451_v10 = vsel %vm449_vm13, %v448_v8, %v429_v9 }
 0x2eb   :  { %453 = vst [vmem:[%s728_s6 + $0x8] sm:$0xff] %v451_v10 }
 0x2ec   :  { %558 = dma.done.wait [#allocation3], 256  }
 0x2ed   :  { %559 = vsyncadd [#allocation3], 4294967040 }
 0x2ee   :  { %477 = vsyncpa [#allocation3], 1 }

// kernel: poem_lmh_forward.3
= control target key start
LH: loop header
LB: loop body
LE: loop exit
PB: predicated region body
PF: predicated region fallthrough
CT: control target
= control target key end

     0   :  { %s1101_s0 = inlined_call_operand.vmem [shape: f32[2,32], index: 0, kind: input, shape index: {}]   ;;  %s1102_s1 = inlined_call_operand.vmem [shape: f32[2,32], index: 1, kind: input, shape index: {}]   ;;  %s1103_s2 = inlined_call_operand.vmem [shape: f32[2,4,32], index: 2, kind: input, shape index: {}]   ;;  %s1104_s3 = inlined_call_operand.vmem [shape: f32[2,128], index: 3, kind: input, shape index: {}]   ;;  %s1105_s4 = inlined_call_operand.vmem [shape: bf16[32,4], index: 4, kind: input, shape index: {}]   ;;  %s1106_s5 = inlined_call_operand.vmem [shape: f32[1,4], index: 5, kind: input, shape index: {}]   ;;  %s1107_s6 = inlined_call_operand.vmem [shape: bf16[32,32], index: 6, kind: input, shape index: {}]   ;;  %s1108_s7 = inlined_call_operand.vmem [shape: bf16[32,32], index: 7, kind: input, shape index: {}]   ;;  %s1109_s8 = inlined_call_operand.vmem [shape: f32[1,32], index: 8, kind: input, shape index: {}]   ;;  %s1110_s9 = inlined_call_operand.vmem [shape: bf16[32,32], index: 9, kind: input, shape index: {}]   ;;  %s1111_s10 = inlined_call_operand.vmem [shape: f32[1,32], index: 10, kind: input, shape index: {}]   ;;  %s1112_s11 = inlined_call_operand.vmem [shape: f32[1,32], index: 11, kind: input, shape index: {}]   ;;  %s1113_s12 = inlined_call_operand.vmem [shape: f32[1,32], index: 12, kind: input, shape index: {}]   ;;  %s1114_s13 = inlined_call_operand.vmem [shape: f32[1,32], index: 13, kind: input, shape index: {}]   ;;  %s1115_s14 = inlined_call_operand.vmem [shape: f32[1,32], index: 14, kind: input, shape index: {}]   ;;  %s1116_s15 = inlined_call_operand.vmem [shape: bf16[32,128], index: 15, kind: input, shape index: {}]   ;;  %s1117_s16 = inlined_call_operand.vmem [shape: f32[1,128], index: 16, kind: input, shape index: {}]   ;;  %s1118_s17 = inlined_call_operand.vmem [shape: bf16[32,1], index: 17, kind: input, shape index: {}]   ;;  %s1119_s18 = inlined_call_operand.<no memory space> [shape: f32[1,1], index: 18, kind: input, shape index: {}]   ;;  %s1120_s20 = inlined_call_operand.hbm [shape: f32[2,128], index: 20, kind: output, shape index: {0}]   ;;  %s1121_s21 = inlined_call_operand.vmem [shape: f32[2,1], index: 21, kind: output, shape index: {1}]   ;;  %s1122_s19 = inlined_call_operand.<no memory space> [shape: f32[1,1], index: 19, kind: input, shape index: {}]  }
   0x1   :  { %1125 = sst [smem:[#allocation7_spill]] %s1101_s0  ;;  %v27_v0 = vstv %s1119_s18  ;;  %v29_v1 = vstv %s1122_s19 }
   0x2   :  { %1126 = sst [smem:[#allocation8_spill]] %s1102_s1  ;;  %28 = vst [vmem:[#allocation2] sm:$0x1] %v27_v0  ;;  %30 = vst [vmem:[#allocation3] sm:$0x1] %v29_v1 }
   0x3   :  { %1127 = sst [smem:[#allocation9_spill]] %s1103_s2 }
   0x4   :  { %1128 = sst [smem:[#allocation10_spill]] %s1104_s3 }
   0x5   :  { %1129 = sst [smem:[#allocation11_spill]] %s1105_s4 }
   0x6   :  { %1130 = sst [smem:[#allocation12_spill]] %s1106_s5 }
   0x7   :  { %s1131_s29 = sld [smem:[#allocation11_spill]]  ;;  %v841_v3 = vmov 0.0   ;;  %vm842_vm0 = vmmov 0   ;;  %vm102_vm1 = vcmask 261120  }
   0x8   :  { %721 = vmatprep.subr.bf16.mxu0 %v841_v3  ;;  %729 = vmatprep.subr.bf16.mxu1 %v841_v3  ;;  %s1132_s30 = sld [smem:[#allocation7_spill]] }
   0x9   :  { %725 = vmatprep.mubr.msk.bf16.mxu0 %vm842_vm0, %v841_v3  ;;  %733 = vmatprep.mubr.msk.bf16.mxu1 %vm842_vm0, %v841_v3 }
   0xd   :  { %v775_v2 = vld [vmem:[%s1131_s29 + $0x8] sm:$0xff]   ;;  %v776_v4 = vld [vmem:[%s1131_s29] sm:$0xff]  }
   0xe   :  { %722 = vmatpush3.bf16.msra.mxu0 %v775_v2  ;;  %v73_v5 = vld [vmem:[%s1132_s30] sm:$0x3] }
   0xf   :  { %723 = vmatprep.subr.bf16.mxu0 %v841_v3  ;;  %v977_v6 = vpack.c.bf16 %v73_v5, %v73_v5 }
  0x12   :  { %724 = vmatpush3.bf16.msra.mxu0 %v776_v4 }
  0x13   :  { %737 = vmatprep.subr.bf16.mxu0 %v841_v3 }
  0x15   :  { %726 = vmatmul.mubr.msk.bf16.vlgmr.msra.gmra.mxu0 %vm102_vm1, %v977_v6 }
  0x16   :  { %31 = vsyncpa [#allocation5], 0  ;;  %741 = vmatprep.mubr.msk.bf16.mxu0 %vm842_vm0, %v841_v3  ;;  %s1133_s23 = sld [smem:[#allocation12_spill]]  ;;  %vm146_vm2 = vcmask 25600   ;;  %v158_v20 = vlaneseq  ;;  %v777_v28 = vld [vmem:[%s1108_s7 + $0x8] sm:$0xff]   ;;  %v779_v30 = vld [vmem:[%s1108_s7] sm:$0xff]  }
  0x17   :  { %v778_v29 = vld [vmem:[%s1107_s6 + $0x8] sm:$0xff]   ;;  %730 = vmatpush3.bf16.msra.mxu1 %v777_v28  ;;  %v780_v31 = vld [vmem:[%s1107_s6] sm:$0xff]   ;;  %s1134_s4 = sld [smem:[#allocation8_spill]]  ;;  %vm174_vm3 = vcmask 257024   ;;  %vm204_vm4 = vcmask 1041409   ;;  %vm499_vm6 = vcmask 1041408  }
  0x18   :  { %v159_v21 = vshrl.u32 %v158_v20, 7  ;;  %738 = vmatpush3.bf16.msra.mxu0 %v778_v29  ;;  %731 = vmatprep.subr.bf16.mxu1 %v841_v3  ;;  %s1135_s19 = sld [smem:[#allocation9_spill]]  ;;  %v781_v59 = vld [vmem:[%s1110_s9 + $0x8] sm:$0xff]   ;;  %v782_v61 = vld [vmem:[%s1110_s9] sm:$0xff]   ;;  %s844_s5 = smov [#allocation4]   ;;  %vm657_vm9 = vcmask 1024  }
  0x19   :  { %739 = vmatprep.subr.bf16.mxu0 %v841_v3  ;;  %v783_v2 = vld [vmem:[%s1116_s15 + $0x8] sm:$0xff]   ;;  %v785_v5 = vld [vmem:[%s1116_s15] sm:$0xff]   ;;  %s1136_s30 = sld [smem:[#allocation10_spill]]  ;;  %s665_s22 = sshll.u32 %s844_s5, 4  ;;  %s666_s22 = int_to_ptr.vmem [resolvable:$true] %s665_s22 }
  0x1a   :  { %v988_v22 = vsub.s32 0, %v159_v21  ;;  %v167_v26 = vsub.s32 1, %v159_v21  ;;  %v784_v4 = vld [vmem:[%s1118_s17 + $0x8] sm:$0xff]   ;;  %v692_v29 = vld [vmem:[%s1114_s13] ss:$0 sm:$0xff]  ;;  %s819_s24 = scalar_lea.vmem %s666_s22, 32  ;;  %p824_p1 = scmp.lt.s32.totalorder %s666_s22, %s666_s22 }
  0x1b   :  { %732 = vmatpush3.bf16.msra.mxu1 %v779_v30  ;;  %p820_p0 = scmp.ne.s32.totalorder %s666_s22, %s819_s24  ;;  %p825_p2 = scmp.lt.s32.totalorder %s819_s24, %s819_s24 }
  0x1c   :  { %v677_v7 = vld [vmem:[%s1133_s23] ss:$0 sm:$0xff]  ;;  %740 = vmatpush3.bf16.msra.mxu0 %v780_v31  ;;  %745 = vmatprep.subr.bf16.mxu1 %v841_v3 }
  0x1d   :  { %v74_v32 = vld [vmem:[%s1134_s4] sm:$0x3]  ;;  %753 = vmatprep.subr.bf16.mxu0 %v841_v3  ;;  %p826_p3 = por %p825_p2, %p824_p1 }
  0x1e   :  { %v189_v33 = vpack.c.bf16 %v74_v32, %v74_v32  ;;  %v75_v34 = vld [vmem:[%s1135_s19] sm:$0xf]  ;;  %v76_v37 = vld [vmem:[%s1135_s19 + $0x4] sm:$0xf] }
  0x1f   :  { %p827_p4 = pnand %p826_p3, %p820_p0 }
  0x20   :  { %742 = vmatmul.mubr.msk.bf16.vlgmr.msra.gmra.mxu0 %vm102_vm1, %v189_v33  ;;  %v693_v33 = vld [vmem:[%s1112_s11] ss:$0 sm:$0xff] }
  0x21   :  { %757 = vmatprep.mubr.msk.bf16.mxu0 %vm842_vm0, %v841_v3  ;;  %754 = vmatpush3.bf16.msra.mxu0 %v783_v2 }
  0x22   :  { %755 = vmatprep.subr.bf16.mxu0 %v841_v3 }
  0x25   :  { %756 = vmatpush3.bf16.msra.mxu0 %v785_v5 }
  0xd5   :  { %v140_v8 = vpop.f32.mrf.mxu0 }
  0xd6   :  { %v141_v9 = vadd.f32 %v677_v7, %v140_v8  ;;  %v402_v7 = vld [vmem:[%s1115_s14] sm:$0x1] }
  0xd7   :  { %v727_v10 = vpop.f32.mrf.mxu0  ;;  %v403_v8 = vadd.f32 1e-05, %v402_v7 }
  0xd8   :  { %v147_v11 = vsel %vm146_vm2, %v141_v9, -inf }
  0xd9   :  { %148 = vmax.xlane.f32.xlu0 %v147_v11  ;;  %v143_v12 = vpop.f32.mrf.mxu0 }
  0xdb   :  { %v728_v13 = vpop.f32.mrf.mxu0 }
  0xe0   :  { %v311_v62 = vpop.f32.mrf.mxu0 }
  0xe2   :  { %v743_v63 = vpop.f32.mrf.mxu0 }
  0xe4   :  { %v314_v0 = vpop.f32.mrf.mxu0 }
  0xe6   :  { %v744_v1 = vpop.f32.mrf.mxu0 }
 0x162   :  { %v149_v14 = vpop.xlane.xlu0 %148 }
 0x163   :  { %v150_v15 = vsub.f32 %v141_v9, %v149_v14  ;;  %v688_v14 = vld [vmem:[%s1111_s10] ss:$0 sm:$0xff] }
 0x165   :  { %v151_v16 = vmul.f32 1.442695, %v150_v15 }
 0x167   :  { %787 = vpow2.f32 %v151_v16 }
 0x174   :  { %v788_v17 = vpop.eup %787 }
 0x175   :  { %v153_v18 = vsel %vm146_vm2, %v788_v17, 0.0 }
 0x176   :  { %154 = vadd.xlane.f32.xlu0 %v153_v18 }
 0x1ff   :  { %v155_v19 = vpop.xlane.xlu0 %154 }
 0x200   :  { %789 = vrcp.f32 %v155_v19 }
 0x201   :  { %791 = vrsqrt.f32 %v403_v8 }
 0x20d   :  { %v790_v23 = vpop.eup %789 }
 0x20e   :  { %v157_v24 = vmul.f32 %v790_v23, %v788_v17 }
 0x210   :  { %v161_v25 = vrot.slane %v157_v24, %v988_v22  ;;  %v168_v27 = vrot.slane %v157_v24, %v167_v26 }
 0x212   :  { %163 = vbcast.lane.b32.xlu1 %v161_v25, 256  ;;  %v792_v25 = vpop.eup %791 }
 0x213   :  { %v409_v30 = vrot.slane %v792_v25, %v988_v22 }
 0x216   :  { %170 = vbcast.lane.b32.xlu1 %v168_v27, 256 }
 0x284   :  { %v164_v35 = vpop.permute.xlu1 %163 }
 0x285   :  { %v172_v36 = vmul.f32 %v164_v35, %v75_v34  ;;  %v694_v35 = vld [vmem:[%s1113_s12] ss:$0 sm:$0xff] }
 0x287   :  { %v175_v38 = vsel %vm174_vm3, %v172_v36, 0.0 }
 0x288   :  { %v176_v39 = vrot.slane %v175_v38, 4  ;;  %v171_v40 = vpop.permute.xlu1 %170 }
 0x289   :  { %v173_v41 = vmul.f32 %v171_v40, %v76_v37 }
 0x28a   :  { %v177_v42 = vadd.f32 %v176_v39, %v175_v38  ;;  %v596_v39 = vld [vmem:[#allocation3] sm:$0x1] }
 0x28b   :  { %v182_v43 = vsel %vm174_vm3, %v173_v41, 0.0  ;;  %v597_v40 = vsub.f32 0.0, %v596_v39 }
 0x28c   :  { %v178_v44 = vrot.slane %v177_v42, 2  ;;  %v183_v45 = vrot.slane %v182_v43, 4 }
 0x28d   :  { %v598_v41 = vmul.f32 1.442695, %v597_v40 }
 0x28e   :  { %v179_v46 = vadd.f32 %v178_v44, %v177_v42  ;;  %v184_v47 = vadd.f32 %v183_v45, %v182_v43  ;;  %v843_v44 = vmov 0  }
 0x28f   :  { %793 = vpow2.f32 %v598_v41  ;;  %773 = vset.pattern.permute.xlu1 %v843_v44  ;;  %774 = vset.pattern.permute.xlu0 %v843_v44 }
 0x290   :  { %v180_v48 = vrot.slane %v179_v46, 1  ;;  %v185_v49 = vrot.slane %v184_v47, 2 }
 0x292   :  { %v181_v50 = vadd.f32 %v180_v48, %v179_v46  ;;  %v186_v51 = vadd.f32 %v185_v49, %v184_v47  ;;  %v1071_v47 = vand.u32 127, %v158_v20  ;;  %v695_v48 = vld [vmem:[%s1117_s16] ss:$0 sm:$0xff] }
 0x293   :  { %v699_v49 = vld [vmem:[#allocation2] ss:$0 sm:$0xff] }
 0x294   :  { %v187_v52 = vrot.slane %v186_v51, 1  ;;  %v194_v53 = vpack.c.bf16 %v181_v50, %v181_v50  ;;  %vm497_vm5 = vcmp.lt.s32.totalorder %v1071_v47, 10 }
 0x296   :  { %v188_v54 = vadd.f32 %v187_v52, %v186_v51  ;;  %v202_v56 = vunpack.c.l.b16 %v194_v53 }
 0x298   :  { %v195_v55 = vpack.c.bf16 %v188_v54, %v188_v54 }
 0x29a   :  { %v203_v57 = vunpack.c.l.b16 %v195_v55 }
 0x29c   :  { %v205_v58 = vsel %vm204_vm4, %v203_v57, %v202_v56  ;;  %v794_v42 = vpop.eup %793 }
 0x29d   :  { %v206_v60 = vpack.c.b16 %v205_v58, %v205_v58  ;;  %v600_v43 = vadd.f32 1.0, %v794_v42 }
 0x29f   :  { %734 = vmatmul.mubr.msk.bf16.vlgmr.msra.gmra.mxu1 %vm102_vm1, %v206_v60  ;;  %795 = vrcp.f32 %v600_v43 }
 0x2a0   :  { %746 = vmatpush3.bf16.msra.mxu1 %v781_v59  ;;  %749 = vmatprep.mubr.msk.bf16.mxu1 %vm842_vm0, %v841_v3 }
 0x2a1   :  { %747 = vmatprep.subr.bf16.mxu1 %v841_v3 }
 0x2a4   :  { %748 = vmatpush3.bf16.msra.mxu1 %v782_v61 }
 0x2a5   :  { %761 = vmatprep.subr.bf16.mxu1 %v841_v3 }
 0x2a7   :  { %750 = vmatmul.mubr.msk.bf16.vlgmr.msra.gmra.mxu1 %vm102_vm1, %v977_v6  ;;  %v786_v6 = vld [vmem:[%s1118_s17] sm:$0xff]  }
 0x2a8   :  { %765 = vmatprep.mubr.msk.bf16.mxu1 %vm842_vm0, %v841_v3  ;;  %762 = vmatpush3.bf16.msra.mxu1 %v784_v4 }
 0x2a9   :  { %763 = vmatprep.subr.bf16.mxu1 %v841_v3  ;;  %v687_v3 = vld [vmem:[%s1109_s8] ss:$0 sm:$0xff] }
 0x2ac   :  { %764 = vmatpush3.bf16.msra.mxu1 %v786_v6  ;;  %v796_v45 = vpop.eup %795 }
 0x2ad   :  { %v607_v46 = vrot.slane %v796_v45, %v988_v22 }
 0x2af   :  { %609 = vperm.xlu1 %773, %v607_v46  }
 0x35f   :  { %v256_v9 = vpop.f32.mrf.mxu1 }
 0x360   :  { %v312_v12 = vadd.f32 %v311_v62, %v256_v9 }
 0x361   :  { %v735_v10 = vpop.f32.mrf.mxu1 }
 0x362   :  { %v324_v16 = vadd.f32 %v687_v3, %v312_v12  ;;  %v77_v3 = vld [vmem:[%s1136_s30] sm:$0x3] }
 0x363   :  { %v259_v11 = vpop.f32.mrf.mxu1 }
 0x365   :  { %v736_v13 = vpop.f32.mrf.mxu1 }
 0x366   :  { %v610_v13 = vpop.permute.xlu1 %609 }
 0x367   :  { %v382_v15 = vpop.f32.mrf.mxu1 }
 0x368   :  { %v383_v17 = vadd.f32 %v688_v14, %v382_v15 }
 0x369   :  { %v751_v18 = vpop.f32.mrf.mxu1 }
 0x36a   :  { %v388_v19 = vsub.f32 %v324_v16, %v383_v17  ;;  %v391_v21 = vadd.f32 %v383_v17, %v324_v16  ;;  %v612_v16 = vadd.f32 %v610_v13, %v77_v3 }
 0x36b   :  { %v385_v23 = vpop.f32.mrf.mxu1 }
 0x36c   :  { %v389_v24 = vmul.f32 %v388_v19, %v388_v19  ;;  %v392_v28 = vmax.f32 %v391_v21, 0.0  ;;  %v613_v18 = vadd.f32 1e-16, %v612_v16 }
 0x36d   :  { %v752_v26 = vpop.f32.mrf.mxu1 }
 0x36e   :  { %v390_v27 = vsub.f32 0.0, %v389_v24 }
 0x370   :  { %v393_v31 = vadd.f32 %v392_v28, %v390_v27 }
 0x372   :  { %v401_v32 = vsub.f32 %v393_v31, %v692_v29 }
 0x374   :  { %v411_v34 = vmul.f32 %v409_v30, %v401_v32 }
 0x376   :  { %v419_v36 = vmul.f32 %v693_v33, %v411_v34 }
 0x378   :  { %v427_v37 = vadd.f32 %v694_v35, %v419_v36 }
 0x37a   :  { %v428_v38 = vpack.c.bf16 %v427_v37, %v427_v37 }
 0x37c   :  { %758 = vmatmul.mubr.msk.bf16.vlgmr.msra.gmra.mxu0 %vm102_vm1, %v428_v38  ;;  %766 = vmatmul.mubr.msk.bf16.vlgmr.msra.gmra.mxu1 %vm102_vm1, %v428_v38 }
 0x43c   :  { %v489_v50 = vpop.f32.mrf.mxu0  ;;  %v571_v51 = vpop.f32.mrf.mxu1 }
 0x43d   :  { %v490_v52 = vadd.f32 %v695_v48, %v489_v50  ;;  %v572_v53 = vadd.f32 %v699_v49, %v571_v51 }
 0x43e   :  { %v759_v54 = vpop.f32.mrf.mxu0  ;;  %v767_v55 = vpop.f32.mrf.mxu1 }
 0x43f   :  { %v578_v56 = vsub.f32 0.0, %v572_v53  ;;  %v498_v22 = vsel %vm497_vm5, %v490_v52, -1e+30  ;;  %v577_v9 = vmax.f32 %v572_v53, 0.0 }
 0x440   :  { %v492_v20 = vpop.f32.mrf.mxu0  ;;  %v574_v57 = vpop.f32.mrf.mxu1  ;;  %v500_v58 = vsel %vm499_vm6, %v498_v22, -inf }
 0x441   :  { %v581_v59 = vand.u32 2147483647, %v578_v56  ;;  %501 = vmax.xlane.f32.xlu0 %v500_v58  ;;  %vm579_vm8 = vcmp.ne.f32.partialorder %v578_v56, %v578_v56 }
 0x442   :  { %v760_v60 = vpop.f32.mrf.mxu0  ;;  %v768_v61 = vpop.f32.mrf.mxu1 }
 0x443   :  { %v582_v62 = vsub.f32 0.0, %v581_v59 }
 0x445   :  { %v583_v63 = vmul.f32 1.442695, %v582_v62 }
 0x447   :  { %797 = vpow2.f32 %v583_v63 }
 0x454   :  { %v798_v0 = vpop.eup %797 }
 0x455   :  { %v585_v1 = vadd.f32 1.0, %v798_v0  ;;  %v588_v2 = vmul.f32 -0.5, %v798_v0  ;;  %v591_v5 = vand.u32 2147483647, %v798_v0 }
 0x457   :  { %799 = vlog2.f32 %v585_v1  ;;  %v589_v4 = vadd.f32 1.0, %v588_v2  ;;  %vm592_vm7 = vcmp.lt.f32.partialorder %v591_v5, 0.0004427343 }
 0x459   :  { %v590_v8 = vmul.f32 %v798_v0, %v589_v4 }
 0x464   :  { %v800_v6 = vpop.eup %799 }
 0x465   :  { %v587_v7 = vmul.f32 0.6931472, %v800_v6 }
 0x467   :  { %v593_v10 = vsel %vm592_vm7, %v590_v8, %v587_v7 }
 0x468   :  { %v594_v11 = vadd.f32 %v593_v10, %v577_v9 }
 0x46a   :  { %v595_v12 = vsel %vm579_vm8, %v572_v53, %v594_v11 }
 0x46b   :  { %618 = vperm.xlu0 %774, %v595_v12  }
 0x4ca   :  { %v502_v14 = vpop.xlane.xlu0 %501 }
 0x4cb   :  { %v503_v15 = vsub.f32 %v498_v22, %v502_v14 }
 0x4cd   :  { %v504_v17 = vmul.f32 1.442695, %v503_v15 }
 0x4cf   :  { %801 = vpow2.f32 %v504_v17 }
 0x4d0   :  { %803 = vlog2.f32 %v613_v18 }
 0x4dc   :  { %v802_v19 = vpop.eup %801 }
 0x4dd   :  { %v506_v21 = vsel %vm499_vm6, %v802_v19, 0.0  ;;  %v804_v23 = vpop.eup %803 }
 0x4de   :  { %507 = vadd.xlane.f32.xlu1 %v506_v21  ;;  %v615_v24 = vmul.f32 0.6931472, %v804_v23 }
 0x4e6   :  { %v619_v25 = vpop.permute.xlu0 %618 }
 0x4e7   :  { %v621_v26 = vmul.f32 %v619_v25, %v615_v24 }
 0x4e9   :  { %v622_v27 = vsel %vm497_vm5, %v621_v26, -1e+30 }
 0x4ea   :  { %v637_v28 = vsel %vm499_vm6, %v622_v27, -inf }
 0x4eb   :  { %638 = vmax.xlane.f32.xlu1 %v637_v28 }
 0x567   :  { %v508_v29 = vpop.xlane.xlu1 %507 }
 0x568   :  { %805 = vrcp.f32 %v508_v29 }
 0x574   :  { %v639_v30 = vpop.xlane.xlu1 %638 }
 0x575   :  { %v806_v31 = vpop.eup %805  ;;  %v640_v32 = vsub.f32 %v622_v27, %v639_v30 }
 0x576   :  { %v510_v33 = vmul.f32 %v806_v31, %v802_v19 }
 0x577   :  { %v641_v34 = vmul.f32 1.442695, %v640_v32 }
 0x578   :  { %v511_v35 = vadd.f32 1e-16, %v510_v33 }
 0x579   :  { %807 = vpow2.f32 %v641_v34 }
 0x57a   :  { %809 = vlog2.f32 %v511_v35 }
 0x586   :  { %v808_v36 = vpop.eup %807 }
 0x587   :  { %v810_v37 = vpop.eup %809  ;;  %v643_v38 = vsel %vm499_vm6, %v808_v36, 0.0 }
 0x588   :  { %644 = vadd.xlane.f32.xlu1 %v643_v38  ;;  %v513_v39 = vmul.f32 0.6931472, %v810_v37 }
 0x58a   :  { %v623_v40 = vadd.f32 %v622_v27, %v513_v39 }
 0x58c   :  { %v624_v41 = vsel %vm497_vm5, %v623_v40, -1e+30 }
 0x58d   :  { %v625_v42 = vsel %vm499_vm6, %v624_v41, -inf }
 0x58e   :  { %626 = vmax.xlane.f32.xlu0 %v625_v42 }
 0x611   :  { %v645_v43 = vpop.xlane.xlu1 %644 }
 0x612   :  { %811 = vrcp.f32 %v645_v43 }
 0x617   :  { %v627_v44 = vpop.xlane.xlu0 %626 }
 0x618   :  { %v628_v45 = vsub.f32 %v624_v41, %v627_v44 }
 0x61a   :  { %v629_v46 = vmul.f32 1.442695, %v628_v45 }
 0x61c   :  { %813 = vpow2.f32 %v629_v46 }
 0x61f   :  { %v812_v48 = vpop.eup %811 }
 0x620   :  { %v647_v49 = vmul.f32 %v812_v48, %v808_v36 }
 0x622   :  { %v648_v50 = vadd.f32 1e-16, %v647_v49 }
 0x624   :  { %815 = vlog2.f32 %v648_v50 }
 0x629   :  { %v814_v51 = vpop.eup %813 }
 0x62a   :  { %v631_v52 = vsel %vm499_vm6, %v814_v51, 0.0 }
 0x62b   :  { %632 = vadd.xlane.f32.xlu1 %v631_v52 }
 0x631   :  { %v816_v53 = vpop.eup %815 }
 0x632   :  { %v650_v54 = vmul.f32 0.6931472, %v816_v53 }
 0x634   :  { %v651_v55 = vmul.f32 %v650_v54, %v647_v49 }
 0x636   :  { %v652_v56 = vsel %vm497_vm5, %v651_v55, 0.0 }
 0x637   :  { %v653_v22 = vsel %vm499_vm6, %v652_v56, 0.0 }
 0x638   :  { %654 = vadd.xlane.f32.xlu1 %v653_v22 }
 0x6b4   :  { %v633_v20 = vpop.xlane.xlu1 %632 }
 0x6b5   :  { %817 = vrcp.f32 %v633_v20 }
 0x6c1   :  { %v655_v57 = vpop.xlane.xlu1 %654 }
 0x6c2   :  { %v818_v58 = vpop.eup %817  ;;  %v656_v59 = vsub.f32 0.0, %v655_v57 }
 0x6c3   :  { %v635_v60 = vmul.f32 %v818_v58, %v814_v51 }
 0x6c4   :  { %658 = vst.msk [vmem:[%s1121_s21] sm:$0x3] %vm657_vm9, %v656_v59 }
 0x6c5   :  { %636 = vst [vmem:[#allocation4] sm:$0x3] %v635_v60 }
 0x6c6   :  { %830 = shalt.err (!%p827_p4)
}
 0x6c7   :  { %668 = dma.vmem_to_hbm [thread:$0]  %s666_s22, 32, %s1120_s20, [#allocation5]  }
 0x6c8   :  { %839 = dma.done.wait [#allocation5], 32  }
 0x6c9   :  { %840 = vsyncadd [#allocation5], 4294967264 }
 0x6ca   :  { %676 = vsyncpa [#allocation5], 1 }

</bundles_post_ra>
